<compile_context>
chip_gen: v5e
topology: v5e:2x2
jax: 0.10.0
libtpu: 0.0.40
codegen_flags: <defaults>
</compile_context>

<pallas_src>
import functools

import jax
import jax.numpy as jnp
import numpy as np
from jax.experimental import pallas as pl
from jax.experimental.pallas import tpu as pltpu


_VMEM_LIMIT = 32 * 1024 * 1024  # conservative scoped-VMEM budget (v5e/v6e/v7x)


# ------------------------------ Pallas kernels ------------------------------ #

def _down_up_stats_kernel(xs_ref, wd_ref, wu_ref,
                          y2_ref, sum_ref, sq_ref, y1p_ref,
                          *, ho, wo, c_in, inner_nc, outer_nc):
    """Per-batch fused kernel.

    LeakyReLU(0.2) -> Conv2d(4,2,1) [ReLU fused] -> ConvTranspose2d(4,2,1)
    (phase-decomposed, y1 resident in VMEM) -> per-channel sum/sumsq partials
    for BatchNorm.  Grid = (batch,), 'parallel'.
    """
    m = ho * wo
    k4 = 4 * c_in

    # LeakyReLU applied once per element on the space-to-depth tile
    # (zero padding commutes with LeakyReLU).  bf16 in HBM, f32 in VMEM.
    x = xs_ref[...].astype(jnp.float32)
    x = jnp.where(x > 0, x, 0.2 * x)

    # ---- down conv: in-kernel im2col (4 shifted taps, concatenated K) ----
    taps = []
    for ta in range(2):
        for tb in range(2):
            t = x[ta:ta + ho, tb:tb + wo, :]              # (ho, wo, 4*c_in)
            taps.append(t.reshape(m, k4))
    lhs_d = jnp.concatenate(taps, axis=-1).astype(jnp.bfloat16)   # (m, 16*c_in)
    y1 = jnp.dot(lhs_d, wd_ref[...], preferred_element_type=jnp.float32)
    y1 = jnp.maximum(y1, 0.0)                             # fused ReLU epilogue

    # ---- stage zero-padded y1 in VMEM scratch for the up-conv taps ----
    y1p_ref[...] = jnp.zeros((ho + 2, wo + 2, inner_nc), jnp.float32)
    y1p_ref[1:ho + 1, 1:wo + 1, :] = y1.reshape(ho, wo, inner_nc)

    # ---- up conv: 4 output-parity GEMMs (K = 4*inner_nc) + BN partials ----
    s_tot = jnp.zeros((1, outer_nc), jnp.float32)
    sq_tot = jnp.zeros((1, outer_nc), jnp.float32)
    for ph in range(2):
        per_pw = []
        for pw in range(2):
            utaps = []
            for dh in range(2):
                for dw in range(2):
                    u = y1p_ref[ph + dh:ph + dh + ho, pw + dw:pw + dw + wo, :]
                    utaps.append(u.reshape(m, inner_nc))
            lhs_u = jnp.concatenate(utaps, axis=-1).astype(jnp.bfloat16)
            yp = jnp.dot(lhs_u, wu_ref[2 * ph + pw],
                         preferred_element_type=jnp.float32)      # (m, outer)
            s_tot = s_tot + jnp.sum(yp, axis=0, keepdims=True)
            sq_tot = sq_tot + jnp.sum(yp * yp, axis=0, keepdims=True)
            per_pw.append(yp.reshape(ho, wo, outer_nc))
        # channel layout (pw, c) so the consumer block is a plain lane slice.
        y2_ref[ph] = jnp.concatenate(per_pw, axis=-1)     # (ho, wo, 2*outer)

    sum_ref[...] = s_tot
    sq_ref[...] = sq_tot


def _bn_apply_concat_kernel(y2_ref, x_ref, scale_ref, shift_ref, out_ref,
                            *, c_in, outer_nc):
    """BN affine apply + output-parity scatter + skip concat.

    Grid = (batch, row-parity); each block covers both column parities via the
    (pw, channel) lane packing, so the output reshapes directly to NHWC.
    """
    y = y2_ref[...] * scale_ref[...] + shift_ref[...]     # (ho, wo, 2*outer)
    x = x_ref[...]                                        # (ho, wo, 2*c_in)
    out_ref[...] = jnp.concatenate(
        [x[:, :, :c_in], y[:, :, :outer_nc],              # pw = 0: [skip, up]
         x[:, :, c_in:], y[:, :, outer_nc:]],             # pw = 1: [skip, up]
        axis=-1)


# --------------------------------- forward ---------------------------------- #

def unet_innermost_block(x, w_down, w_up, gamma, beta, eps=1e-5):
    """x: (N, C_in, H, W) NCHW float32; returns (N, C_in + outer_nc, H, W).

    w_down: Conv2d weight        (inner_nc, input_nc, 4, 4)   (PyTorch OIHW)
    w_up:   ConvTranspose2d wt   (inner_nc, outer_nc, 4, 4)   (PyTorch IOHW)
    Skip branch uses the original (un-activated) x, matching the module.
    """
    n, c_in, h, w = x.shape
    inner_nc = w_down.shape[0]
    outer_nc = w_up.shape[1]
    assert h % 2 == 0 and w % 2 == 0
    ho, wo = h // 2, w // 2
    ho1, wo1 = ho + 1, wo + 1
    c4 = 4 * c_in
    c_tot = c_in + outer_nc
    f32 = jnp.float32

    # ---- layout prep (single small XLA pass each; no im2col blow-up) ----
    x_nhwc = jnp.transpose(x, (0, 2, 3, 1))                          # (n,h,w,c)
    x_pad = jnp.pad(x_nhwc, ((0, 0), (1, 1), (1, 1), (0, 0)))
    xs = (x_pad.reshape(n, ho1, 2, wo1, 2, c_in)                     # space-to-depth
               .transpose(0, 1, 3, 2, 4, 5)
               .reshape(n, ho1, wo1, c4)
               .astype(jnp.bfloat16))
    x_skip = x_nhwc.reshape(n, ho, 2, wo, 2 * c_in)                  # free reshape

    # down weight -> (16*c_in, inner_nc); rows ordered (ta, tb, dh, dw, c)
    wd = jnp.transpose(w_down, (2, 3, 1, 0))                         # (kh,kw,c,o)
    wd = wd.reshape(2, 2, 2, 2, c_in, inner_nc).transpose(0, 2, 1, 3, 4, 5)
    wd_mat = wd.reshape(16 * c_in, inner_nc).astype(jnp.bfloat16)

    # up weight -> (4 phases, 4*inner_nc, outer_nc); rows ordered (dh, dw, ci)
    wu_rows = []
    for ph in range(2):
        for pw in range(2):
            rows = []
            for dh in range(2):
                for dw in range(2):
                    rows.append(w_up[:, :, 3 - ph - 2 * dh, 3 - pw - 2 * dw])
            wu_rows.append(jnp.stack(rows, axis=0).reshape(4 * inner_nc, outer_nc))
    wu_mat = jnp.stack(wu_rows, axis=0).astype(jnp.bfloat16)         # (4, 4i, o)

    # ---- kernel 1: fused down -> up -> BN partial stats (grid over batch) ----
    k1 = functools.partial(_down_up_stats_kernel, ho=ho, wo=wo, c_in=c_in,
                           inner_nc=inner_nc, outer_nc=outer_nc)
    y2, s, sq = pl.pallas_call(
        k1,
        out_shape=(jax.ShapeDtypeStruct((n, 2, ho, wo, 2 * outer_nc), f32),
                   jax.ShapeDtypeStruct((n, 1, outer_nc), f32),
                   jax.ShapeDtypeStruct((n, 1, outer_nc), f32)),
        grid=(n,),
        in_specs=[
            pl.BlockSpec((None, ho1, wo1, c4), lambda b: (b, 0, 0, 0)),
            pl.BlockSpec((16 * c_in, inner_nc), lambda b: (0, 0)),
            pl.BlockSpec((4, 4 * inner_nc, outer_nc), lambda b: (0, 0, 0)),
        ],
        out_specs=(
            pl.BlockSpec((None, 2, ho, wo, 2 * outer_nc),
                         lambda b: (b, 0, 0, 0, 0)),
            pl.BlockSpec((None, 1, outer_nc), lambda b: (b, 0, 0)),
            pl.BlockSpec((None, 1, outer_nc), lambda b: (b, 0, 0)),
        ),
        scratch_shapes=[pltpu.VMEM((ho + 2, wo + 2, inner_nc), f32)],
        compiler_params=pltpu.CompilerParams(
            dimension_semantics=("parallel",),
            vmem_limit_bytes=_VMEM_LIMIT),
    )(xs, wd_mat, wu_mat)

    # ---- BatchNorm2d batch statistics (per-channel scalars, plain XLA) ----
    count = float(n * h * w)
    mean = jnp.sum(s, axis=(0, 1)) / count                           # (outer,)
    var = jnp.maximum(jnp.sum(sq, axis=(0, 1)) / count - mean * mean, 0.0)
    scale = gamma * jax.lax.rsqrt(var + eps)
    shift = beta - mean * scale
    scale2 = jnp.tile(scale, 2).reshape(1, 1, 2 * outer_nc)          # (pw, c)
    shift2 = jnp.tile(shift, 2).reshape(1, 1, 2 * outer_nc)

    # ---- kernel 2: BN apply + parity scatter + skip concat (n x parity) ----
    k2 = functools.partial(_bn_apply_concat_kernel, c_in=c_in, outer_nc=outer_nc)
    out_r = pl.pallas_call(
        k2,
        out_shape=jax.ShapeDtypeStruct((n, ho, 2, wo, 2 * c_tot), f32),
        grid=(n, 2),
        in_specs=[
            pl.BlockSpec((None, None, ho, wo, 2 * outer_nc),
                         lambda b, p: (b, p, 0, 0, 0)),
            pl.BlockSpec((None, ho, None, wo, 2 * c_in),
                         lambda b, p: (b, 0, p, 0, 0)),
            pl.BlockSpec((1, 1, 2 * outer_nc), lambda b, p: (0, 0, 0)),
            pl.BlockSpec((1, 1, 2 * outer_nc), lambda b, p: (0, 0, 0)),
        ],
        out_specs=pl.BlockSpec((None, ho, None, wo, 2 * c_tot),
                               lambda b, p: (b, 0, p, 0, 0)),
        compiler_params=pltpu.CompilerParams(
            dimension_semantics=("parallel", "parallel"),
            vmem_limit_bytes=_VMEM_LIMIT),
    )(y2, x_skip, scale2, shift2)

    # (n, ho, 2, wo, 2*c_tot) reshapes bit-exactly to NHWC; the final NCHW
    # transpose is kept only to preserve the PyTorch layout contract.
    out_nhwc = out_r.reshape(n, h, w, c_tot)
    return jnp.transpose(out_nhwc, (0, 3, 1, 2))


# ------------------------- pure-JAX reference check ------------------------- #

def _ref_forward(x, w_down, w_up, gamma, beta, eps=1e-5):
    hi = jnp.where(x > 0, x, 0.2 * x)
    hi = jax.lax.conv_general_dilated(
        hi, w_down, window_strides=(2, 2), padding=((1, 1), (1, 1)),
        dimension_numbers=("NCHW", "OIHW", "NCHW"),
        precision=jax.lax.Precision.HIGHEST)
    hi = jnp.maximum(hi, 0.0)
    wu_conv = jnp.transpose(w_up, (1, 0, 2, 3))[:, :, ::-1, ::-1]
    hi = jax.lax.conv_general_dilated(
        hi, wu_conv, window_strides=(1, 1), padding=((2, 2), (2, 2)),
        lhs_dilation=(2, 2),
        dimension_numbers=("NCHW", "OIHW", "NCHW"),
        precision=jax.lax.Precision.HIGHEST)
    mean = hi.mean(axis=(0, 2, 3), keepdims=True)
    var = ((hi - mean) ** 2).mean(axis=(0, 2, 3), keepdims=True)
    hi = (hi - mean) * jax.lax.rsqrt(var + eps) * gamma.reshape(1, -1, 1, 1) \
         + beta.reshape(1, -1, 1, 1)
    return jnp.concatenate([x, hi], axis=1)


# ----------------------------------- main ----------------------------------- #

if __name__ == "__main__":
    key = jax.random.PRNGKey(0)
    n, outer_nc, inner_nc, h, w = 2, 4, 8, 16, 16   # input_nc defaults to outer_nc
    k1, k2, k3, k4, k5 = jax.random.split(key, 5)

    x = jax.random.normal(k1, (n, outer_nc, h, w), jnp.float32)
    # deterministic synthetic parameters; conv biases are disabled because
    # norm_layer == BatchNorm2d in the reference module.
    w_down = jax.random.normal(k2, (inner_nc, outer_nc, 4, 4), jnp.float32) / jnp.sqrt(16.0 * outer_nc)
    w_up = jax.random.normal(k3, (inner_nc, outer_nc, 4, 4), jnp.float32) / jnp.sqrt(16.0 * inner_nc)
    gamma = 1.0 + 0.1 * jax.random.normal(k4, (outer_nc,), jnp.float32)
    beta = 0.1 * jax.random.normal(k5, (outer_nc,), jnp.float32)

    fwd = jax.jit(unet_innermost_block)
    out = jax.block_until_ready(fwd(x, w_down, w_up, gamma, beta))
    assert out.shape == (n, 2 * outer_nc, h, w), out.shape

    ref = jax.block_until_ready(_ref_forward(x, w_down, w_up, gamma, beta))
    np.testing.assert_allclose(np.asarray(out), np.asarray(ref), rtol=2e-2, atol=2e-2)

    print("KERNEL_OK")
</pallas_src>

<mosaic_0001>
module attributes {stable_mosaic.version = 11 : i64} {
  func.func @_down_up_stats_kernel(%arg0: i32, %arg1: memref<1x9x9x16xbf16, #tpu.memory_space<vmem>>, %arg2: memref<64x8xbf16, #tpu.memory_space<vmem>>, %arg3: memref<4x32x4xbf16, #tpu.memory_space<vmem>>, %arg4: memref<1x2x8x8x8xf32, #tpu.memory_space<vmem>>, %arg5: memref<1x1x4xf32, #tpu.memory_space<vmem>>, %arg6: memref<1x1x4xf32, #tpu.memory_space<vmem>>, %arg7: memref<10x10x8xf32, #tpu.memory_space<vmem>>) attributes {dimension_semantics = [#tpu.dimension_semantics<parallel>], iteration_bounds = array<i64: 2>, scalar_prefetch = 0 : i64, scratch_operands = 1 : i64, tpu.core_type = #tpu.core_type<tc>, window_params = [{transform_indices = @transform_0, window_bounds = array<i64: 1, 9, 9, 16>}, {pipeline_mode = #tpu.pipeline_mode<synchronous>, transform_indices = @transform_1, window_bounds = array<i64: 64, 8>}, {pipeline_mode = #tpu.pipeline_mode<synchronous>, transform_indices = @transform_2, window_bounds = array<i64: 4, 32, 4>}, {transform_indices = @transform_3, window_bounds = array<i64: 1, 2, 8, 8, 8>}, {transform_indices = @transform_4, window_bounds = array<i64: 1, 1, 4>}, {transform_indices = @transform_5, window_bounds = array<i64: 1, 1, 4>}]} {
    %c0 = arith.constant 0 : index
    %c0_0 = arith.constant 0 : index
    %c0_1 = arith.constant 0 : index
    %c0_2 = arith.constant 0 : index
    %0 = vector.load %arg1[%c0, %c0_0, %c0_1, %c0_2] : memref<1x9x9x16xbf16, #tpu.memory_space<vmem>>, vector<1x9x9x16xbf16>
    %1 = vector.shape_cast %0 : vector<1x9x9x16xbf16> to vector<9x9x16xbf16>
    %2 = arith.extf %1 : vector<9x9x16xbf16> to vector<9x9x16xf32>
    %cst = arith.constant 0.000000e+00 : f32
    %3 = vector.broadcast %cst : f32 to vector<9x9x16xf32>
    %4 = arith.cmpf ogt, %2, %3 : vector<9x9x16xf32>
    %cst_3 = arith.constant 2.000000e-01 : f32
    %5 = vector.broadcast %cst_3 : f32 to vector<9x9x16xf32>
    %6 = arith.mulf %5, %2 : vector<9x9x16xf32>
    %7 = arith.select %4, %2, %6 : vector<9x9x16xi1>, vector<9x9x16xf32>
    %8 = vector.extract_strided_slice %7 {offsets = [0, 0, 0], sizes = [8, 8, 16], strides = [1, 1, 1]} : vector<9x9x16xf32> to vector<8x8x16xf32>
    %9 = vector.shape_cast %8 : vector<8x8x16xf32> to vector<64x16xf32>
    %10 = vector.extract_strided_slice %7 {offsets = [0, 1, 0], sizes = [8, 8, 16], strides = [1, 1, 1]} : vector<9x9x16xf32> to vector<8x8x16xf32>
    %11 = vector.shape_cast %10 : vector<8x8x16xf32> to vector<64x16xf32>
    %12 = vector.extract_strided_slice %7 {offsets = [1, 0, 0], sizes = [8, 8, 16], strides = [1, 1, 1]} : vector<9x9x16xf32> to vector<8x8x16xf32>
    %13 = vector.shape_cast %12 : vector<8x8x16xf32> to vector<64x16xf32>
    %14 = vector.extract_strided_slice %7 {offsets = [1, 1, 0], sizes = [8, 8, 16], strides = [1, 1, 1]} : vector<9x9x16xf32> to vector<8x8x16xf32>
    %15 = vector.shape_cast %14 : vector<8x8x16xf32> to vector<64x16xf32>
    %16 = tpu.concatenate %9, %11, %13, %15 in 1 : vector<64x16xf32>, vector<64x16xf32>, vector<64x16xf32>, vector<64x16xf32> -> vector<64x64xf32>
    %17 = arith.truncf %16 : vector<64x64xf32> to vector<64x64xbf16>
    %c0_4 = arith.constant 0 : index
    %c0_5 = arith.constant 0 : index
    %18 = vector.load %arg2[%c0_4, %c0_5] : memref<64x8xbf16, #tpu.memory_space<vmem>>, vector<64x8xbf16>
    %cst_6 = arith.constant dense<0.000000e+00> : vector<64x8xf32>
    %19 = tpu.matmul %17, %18, %cst_6 {dimension_numbers = #tpu.dot_dimension_numbers<[1], [0], [0], [1], [0, 0, 1, 1], [], []>} : vector<64x64xbf16>, vector<64x8xbf16>, vector<64x8xf32> -> vector<64x8xf32>
    %cst_7 = arith.constant 0.000000e+00 : f32
    %20 = vector.broadcast %cst_7 : f32 to vector<64x8xf32>
    %21 = arith.maximumf %19, %20 : vector<64x8xf32>
    %cst_8 = arith.constant 0.000000e+00 : f32
    %22 = vector.broadcast %cst_8 : f32 to vector<10x10x8xf32>
    %c0_9 = arith.constant 0 : index
    %c0_10 = arith.constant 0 : index
    %c0_11 = arith.constant 0 : index
    %23 = vector.load %arg7[%c0_9, %c0_10, %c0_11] : memref<10x10x8xf32, #tpu.memory_space<vmem>>, vector<10x10x8xf32>
    tpu.vector_store %arg7[%c0_9, %c0_10, %c0_11], %22 {strides = array<i32>} : memref<10x10x8xf32, #tpu.memory_space<vmem>>, vector<10x10x8xf32>,
    %24 = vector.shape_cast %21 : vector<64x8xf32> to vector<8x8x8xf32>
    %c1 = arith.constant 1 : index
    %c1_12 = arith.constant 1 : index
    %c0_13 = arith.constant 0 : index
    %25 = vector.load %arg7[%c1, %c1_12, %c0_13] : memref<10x10x8xf32, #tpu.memory_space<vmem>>, vector<8x8x8xf32>
    tpu.vector_store %arg7[%c1, %c1_12, %c0_13], %24 {strides = array<i32>} : memref<10x10x8xf32, #tpu.memory_space<vmem>>, vector<8x8x8xf32>,
    %cst_14 = arith.constant 0.000000e+00 : f32
    %26 = vector.broadcast %cst_14 : f32 to vector<1x4xf32>
    %cst_15 = arith.constant 0.000000e+00 : f32
    %27 = vector.broadcast %cst_15 : f32 to vector<1x4xf32>
    %c0_16 = arith.constant 0 : index
    %c0_17 = arith.constant 0 : index
    %c0_18 = arith.constant 0 : index
    %28 = vector.load %arg7[%c0_16, %c0_17, %c0_18] : memref<10x10x8xf32, #tpu.memory_space<vmem>>, vector<8x8x8xf32>
    %29 = vector.shape_cast %28 : vector<8x8x8xf32> to vector<64x8xf32>
    %c0_19 = arith.constant 0 : index
    %c1_20 = arith.constant 1 : index
    %c0_21 = arith.constant 0 : index
    %30 = vector.load %arg7[%c0_19, %c1_20, %c0_21] : memref<10x10x8xf32, #tpu.memory_space<vmem>>, vector<8x8x8xf32>
    %31 = vector.shape_cast %30 : vector<8x8x8xf32> to vector<64x8xf32>
    %c1_22 = arith.constant 1 : index
    %c0_23 = arith.constant 0 : index
    %c0_24 = arith.constant 0 : index
    %32 = vector.load %arg7[%c1_22, %c0_23, %c0_24] : memref<10x10x8xf32, #tpu.memory_space<vmem>>, vector<8x8x8xf32>
    %33 = vector.shape_cast %32 : vector<8x8x8xf32> to vector<64x8xf32>
    %c1_25 = arith.constant 1 : index
    %c1_26 = arith.constant 1 : index
    %c0_27 = arith.constant 0 : index
    %34 = vector.load %arg7[%c1_25, %c1_26, %c0_27] : memref<10x10x8xf32, #tpu.memory_space<vmem>>, vector<8x8x8xf32>
    %35 = vector.shape_cast %34 : vector<8x8x8xf32> to vector<64x8xf32>
    %36 = tpu.concatenate %29, %31, %33, %35 in 1 : vector<64x8xf32>, vector<64x8xf32>, vector<64x8xf32>, vector<64x8xf32> -> vector<64x32xf32>
    %37 = arith.truncf %36 : vector<64x32xf32> to vector<64x32xbf16>
    %c0_28 = arith.constant 0 : index
    %c0_29 = arith.constant 0 : index
    %c0_30 = arith.constant 0 : index
    %38 = vector.load %arg3[%c0_28, %c0_29, %c0_30] : memref<4x32x4xbf16, #tpu.memory_space<vmem>>, vector<1x32x4xbf16>
    %39 = vector.shape_cast %38 : vector<1x32x4xbf16> to vector<32x4xbf16>
    %cst_31 = arith.constant dense<0.000000e+00> : vector<64x4xf32>
    %40 = tpu.matmul %37, %39, %cst_31 {dimension_numbers = #tpu.dot_dimension_numbers<[1], [0], [0], [1], [0, 0, 1, 1], [], []>} : vector<64x32xbf16>, vector<32x4xbf16>, vector<64x4xf32> -> vector<64x4xf32>
    %cst_32 = arith.constant dense<0.000000e+00> : vector<4xf32>
    %41 = vector.multi_reduction <add>, %40, %cst_32 [0] : vector<64x4xf32> to vector<4xf32>
    %42 = vector.shape_cast %41 : vector<4xf32> to vector<1x4xf32>
    %43 = arith.addf %26, %42 : vector<1x4xf32>
    %44 = arith.mulf %40, %40 : vector<64x4xf32>
    %cst_33 = arith.constant dense<0.000000e+00> : vector<4xf32>
    %45 = vector.multi_reduction <add>, %44, %cst_33 [0] : vector<64x4xf32> to vector<4xf32>
    %46 = vector.shape_cast %45 : vector<4xf32> to vector<1x4xf32>
    %47 = arith.addf %27, %46 : vector<1x4xf32>
    %48 = vector.shape_cast %40 : vector<64x4xf32> to vector<8x8x4xf32>
    %c0_34 = arith.constant 0 : index
    %c1_35 = arith.constant 1 : index
    %c0_36 = arith.constant 0 : index
    %49 = vector.load %arg7[%c0_34, %c1_35, %c0_36] : memref<10x10x8xf32, #tpu.memory_space<vmem>>, vector<8x8x8xf32>
    %50 = vector.shape_cast %49 : vector<8x8x8xf32> to vector<64x8xf32>
    %c0_37 = arith.constant 0 : index
    %c2 = arith.constant 2 : index
    %c0_38 = arith.constant 0 : index
    %51 = vector.load %arg7[%c0_37, %c2, %c0_38] : memref<10x10x8xf32, #tpu.memory_space<vmem>>, vector<8x8x8xf32>
    %52 = vector.shape_cast %51 : vector<8x8x8xf32> to vector<64x8xf32>
    %c1_39 = arith.constant 1 : index
    %c1_40 = arith.constant 1 : index
    %c0_41 = arith.constant 0 : index
    %53 = vector.load %arg7[%c1_39, %c1_40, %c0_41] : memref<10x10x8xf32, #tpu.memory_space<vmem>>, vector<8x8x8xf32>
    %54 = vector.shape_cast %53 : vector<8x8x8xf32> to vector<64x8xf32>
    %c1_42 = arith.constant 1 : index
    %c2_43 = arith.constant 2 : index
    %c0_44 = arith.constant 0 : index
    %55 = vector.load %arg7[%c1_42, %c2_43, %c0_44] : memref<10x10x8xf32, #tpu.memory_space<vmem>>, vector<8x8x8xf32>
    %56 = vector.shape_cast %55 : vector<8x8x8xf32> to vector<64x8xf32>
    %57 = tpu.concatenate %50, %52, %54, %56 in 1 : vector<64x8xf32>, vector<64x8xf32>, vector<64x8xf32>, vector<64x8xf32> -> vector<64x32xf32>
    %58 = arith.truncf %57 : vector<64x32xf32> to vector<64x32xbf16>
    %c1_45 = arith.constant 1 : index
    %c0_46 = arith.constant 0 : index
    %c0_47 = arith.constant 0 : index
    %59 = vector.load %arg3[%c1_45, %c0_46, %c0_47] : memref<4x32x4xbf16, #tpu.memory_space<vmem>>, vector<1x32x4xbf16>
    %60 = vector.shape_cast %59 : vector<1x32x4xbf16> to vector<32x4xbf16>
    %cst_48 = arith.constant dense<0.000000e+00> : vector<64x4xf32>
    %61 = tpu.matmul %58, %60, %cst_48 {dimension_numbers = #tpu.dot_dimension_numbers<[1], [0], [0], [1], [0, 0, 1, 1], [], []>} : vector<64x32xbf16>, vector<32x4xbf16>, vector<64x4xf32> -> vector<64x4xf32>
    %cst_49 = arith.constant dense<0.000000e+00> : vector<4xf32>
    %62 = vector.multi_reduction <add>, %61, %cst_49 [0] : vector<64x4xf32> to vector<4xf32>
    %63 = vector.shape_cast %62 : vector<4xf32> to vector<1x4xf32>
    %64 = arith.addf %43, %63 : vector<1x4xf32>
    %65 = arith.mulf %61, %61 : vector<64x4xf32>
    %cst_50 = arith.constant dense<0.000000e+00> : vector<4xf32>
    %66 = vector.multi_reduction <add>, %65, %cst_50 [0] : vector<64x4xf32> to vector<4xf32>
    %67 = vector.shape_cast %66 : vector<4xf32> to vector<1x4xf32>
    %68 = arith.addf %47, %67 : vector<1x4xf32>
    %69 = vector.shape_cast %61 : vector<64x4xf32> to vector<8x8x4xf32>
    %70 = tpu.concatenate %48, %69 in 2 : vector<8x8x4xf32>, vector<8x8x4xf32> -> vector<8x8x8xf32>
    %c0_51 = arith.constant 0 : index
    %c0_52 = arith.constant 0 : index
    %c0_53 = arith.constant 0 : index
    %c0_54 = arith.constant 0 : index
    %c0_55 = arith.constant 0 : index
    %71 = vector.load %arg4[%c0_51, %c0_52, %c0_53, %c0_54, %c0_55] : memref<1x2x8x8x8xf32, #tpu.memory_space<vmem>>, vector<1x1x8x8x8xf32>
    %72 = vector.shape_cast %71 : vector<1x1x8x8x8xf32> to vector<8x8x8xf32>
    %73 = vector.shape_cast %70 : vector<8x8x8xf32> to vector<1x1x8x8x8xf32>
    tpu.vector_store %arg4[%c0_51, %c0_52, %c0_53, %c0_54, %c0_55], %73 {strides = array<i32>} : memref<1x2x8x8x8xf32, #tpu.memory_space<vmem>>, vector<1x1x8x8x8xf32>,
    %c1_56 = arith.constant 1 : index
    %c0_57 = arith.constant 0 : index
    %c0_58 = arith.constant 0 : index
    %74 = vector.load %arg7[%c1_56, %c0_57, %c0_58] : memref<10x10x8xf32, #tpu.memory_space<vmem>>, vector<8x8x8xf32>
    %75 = vector.shape_cast %74 : vector<8x8x8xf32> to vector<64x8xf32>
    %c1_59 = arith.constant 1 : index
    %c1_60 = arith.constant 1 : index
    %c0_61 = arith.constant 0 : index
    %76 = vector.load %arg7[%c1_59, %c1_60, %c0_61] : memref<10x10x8xf32, #tpu.memory_space<vmem>>, vector<8x8x8xf32>
    %77 = vector.shape_cast %76 : vector<8x8x8xf32> to vector<64x8xf32>
    %c2_62 = arith.constant 2 : index
    %c0_63 = arith.constant 0 : index
    %c0_64 = arith.constant 0 : index
    %78 = vector.load %arg7[%c2_62, %c0_63, %c0_64] : memref<10x10x8xf32, #tpu.memory_space<vmem>>, vector<8x8x8xf32>
    %79 = vector.shape_cast %78 : vector<8x8x8xf32> to vector<64x8xf32>
    %c2_65 = arith.constant 2 : index
    %c1_66 = arith.constant 1 : index
    %c0_67 = arith.constant 0 : index
    %80 = vector.load %arg7[%c2_65, %c1_66, %c0_67] : memref<10x10x8xf32, #tpu.memory_space<vmem>>, vector<8x8x8xf32>
    %81 = vector.shape_cast %80 : vector<8x8x8xf32> to vector<64x8xf32>
    %82 = tpu.concatenate %75, %77, %79, %81 in 1 : vector<64x8xf32>, vector<64x8xf32>, vector<64x8xf32>, vector<64x8xf32> -> vector<64x32xf32>
    %83 = arith.truncf %82 : vector<64x32xf32> to vector<64x32xbf16>
    %c2_68 = arith.constant 2 : index
    %c0_69 = arith.constant 0 : index
    %c0_70 = arith.constant 0 : index
    %84 = vector.load %arg3[%c2_68, %c0_69, %c0_70] : memref<4x32x4xbf16, #tpu.memory_space<vmem>>, vector<1x32x4xbf16>
    %85 = vector.shape_cast %84 : vector<1x32x4xbf16> to vector<32x4xbf16>
    %cst_71 = arith.constant dense<0.000000e+00> : vector<64x4xf32>
    %86 = tpu.matmul %83, %85, %cst_71 {dimension_numbers = #tpu.dot_dimension_numbers<[1], [0], [0], [1], [0, 0, 1, 1], [], []>} : vector<64x32xbf16>, vector<32x4xbf16>, vector<64x4xf32> -> vector<64x4xf32>
    %cst_72 = arith.constant dense<0.000000e+00> : vector<4xf32>
    %87 = vector.multi_reduction <add>, %86, %cst_72 [0] : vector<64x4xf32> to vector<4xf32>
    %88 = vector.shape_cast %87 : vector<4xf32> to vector<1x4xf32>
    %89 = arith.addf %64, %88 : vector<1x4xf32>
    %90 = arith.mulf %86, %86 : vector<64x4xf32>
    %cst_73 = arith.constant dense<0.000000e+00> : vector<4xf32>
    %91 = vector.multi_reduction <add>, %90, %cst_73 [0] : vector<64x4xf32> to vector<4xf32>
    %92 = vector.shape_cast %91 : vector<4xf32> to vector<1x4xf32>
    %93 = arith.addf %68, %92 : vector<1x4xf32>
    %94 = vector.shape_cast %86 : vector<64x4xf32> to vector<8x8x4xf32>
    %c1_74 = arith.constant 1 : index
    %c1_75 = arith.constant 1 : index
    %c0_76 = arith.constant 0 : index
    %95 = vector.load %arg7[%c1_74, %c1_75, %c0_76] : memref<10x10x8xf32, #tpu.memory_space<vmem>>, vector<8x8x8xf32>
    %96 = vector.shape_cast %95 : vector<8x8x8xf32> to vector<64x8xf32>
    %c1_77 = arith.constant 1 : index
    %c2_78 = arith.constant 2 : index
    %c0_79 = arith.constant 0 : index
    %97 = vector.load %arg7[%c1_77, %c2_78, %c0_79] : memref<10x10x8xf32, #tpu.memory_space<vmem>>, vector<8x8x8xf32>
    %98 = vector.shape_cast %97 : vector<8x8x8xf32> to vector<64x8xf32>
    %c2_80 = arith.constant 2 : index
    %c1_81 = arith.constant 1 : index
    %c0_82 = arith.constant 0 : index
    %99 = vector.load %arg7[%c2_80, %c1_81, %c0_82] : memref<10x10x8xf32, #tpu.memory_space<vmem>>, vector<8x8x8xf32>
    %100 = vector.shape_cast %99 : vector<8x8x8xf32> to vector<64x8xf32>
    %c2_83 = arith.constant 2 : index
    %c2_84 = arith.constant 2 : index
    %c0_85 = arith.constant 0 : index
    %101 = vector.load %arg7[%c2_83, %c2_84, %c0_85] : memref<10x10x8xf32, #tpu.memory_space<vmem>>, vector<8x8x8xf32>
    %102 = vector.shape_cast %101 : vector<8x8x8xf32> to vector<64x8xf32>
    %103 = tpu.concatenate %96, %98, %100, %102 in 1 : vector<64x8xf32>, vector<64x8xf32>, vector<64x8xf32>, vector<64x8xf32> -> vector<64x32xf32>
    %104 = arith.truncf %103 : vector<64x32xf32> to vector<64x32xbf16>
    %c3 = arith.constant 3 : index
    %c0_86 = arith.constant 0 : index
    %c0_87 = arith.constant 0 : index
    %105 = vector.load %arg3[%c3, %c0_86, %c0_87] : memref<4x32x4xbf16, #tpu.memory_space<vmem>>, vector<1x32x4xbf16>
    %106 = vector.shape_cast %105 : vector<1x32x4xbf16> to vector<32x4xbf16>
    %cst_88 = arith.constant dense<0.000000e+00> : vector<64x4xf32>
    %107 = tpu.matmul %104, %106, %cst_88 {dimension_numbers = #tpu.dot_dimension_numbers<[1], [0], [0], [1], [0, 0, 1, 1], [], []>} : vector<64x32xbf16>, vector<32x4xbf16>, vector<64x4xf32> -> vector<64x4xf32>
    %cst_89 = arith.constant dense<0.000000e+00> : vector<4xf32>
    %108 = vector.multi_reduction <add>, %107, %cst_89 [0] : vector<64x4xf32> to vector<4xf32>
    %109 = vector.shape_cast %108 : vector<4xf32> to vector<1x4xf32>
    %110 = arith.addf %89, %109 : vector<1x4xf32>
    %111 = arith.mulf %107, %107 : vector<64x4xf32>
    %cst_90 = arith.constant dense<0.000000e+00> : vector<4xf32>
    %112 = vector.multi_reduction <add>, %111, %cst_90 [0] : vector<64x4xf32> to vector<4xf32>
    %113 = vector.shape_cast %112 : vector<4xf32> to vector<1x4xf32>
    %114 = arith.addf %93, %113 : vector<1x4xf32>
    %115 = vector.shape_cast %107 : vector<64x4xf32> to vector<8x8x4xf32>
    %116 = tpu.concatenate %94, %115 in 2 : vector<8x8x4xf32>, vector<8x8x4xf32> -> vector<8x8x8xf32>
    %c0_91 = arith.constant 0 : index
    %c1_92 = arith.constant 1 : index
    %c0_93 = arith.constant 0 : index
    %c0_94 = arith.constant 0 : index
    %c0_95 = arith.constant 0 : index
    %117 = vector.load %arg4[%c0_91, %c1_92, %c0_93, %c0_94, %c0_95] : memref<1x2x8x8x8xf32, #tpu.memory_space<vmem>>, vector<1x1x8x8x8xf32>
    %118 = vector.shape_cast %117 : vector<1x1x8x8x8xf32> to vector<8x8x8xf32>
    %119 = vector.shape_cast %116 : vector<8x8x8xf32> to vector<1x1x8x8x8xf32>
    tpu.vector_store %arg4[%c0_91, %c1_92, %c0_93, %c0_94, %c0_95], %119 {strides = array<i32>} : memref<1x2x8x8x8xf32, #tpu.memory_space<vmem>>, vector<1x1x8x8x8xf32>,
    %c0_96 = arith.constant 0 : index
    %c0_97 = arith.constant 0 : index
    %c0_98 = arith.constant 0 : index
    %120 = vector.load %arg5[%c0_96, %c0_97, %c0_98] : memref<1x1x4xf32, #tpu.memory_space<vmem>>, vector<1x1x4xf32>
    %121 = vector.shape_cast %120 : vector<1x1x4xf32> to vector<1x4xf32>
    %122 = vector.shape_cast %110 : vector<1x4xf32> to vector<1x1x4xf32>
    tpu.vector_store %arg5[%c0_96, %c0_97, %c0_98], %122 {strides = array<i32>} : memref<1x1x4xf32, #tpu.memory_space<vmem>>, vector<1x1x4xf32>,
    %c0_99 = arith.constant 0 : index
    %c0_100 = arith.constant 0 : index
    %c0_101 = arith.constant 0 : index
    %123 = vector.load %arg6[%c0_99, %c0_100, %c0_101] : memref<1x1x4xf32, #tpu.memory_space<vmem>>, vector<1x1x4xf32>
    %124 = vector.shape_cast %123 : vector<1x1x4xf32> to vector<1x4xf32>
    %125 = vector.shape_cast %114 : vector<1x4xf32> to vector<1x1x4xf32>
    tpu.vector_store %arg6[%c0_99, %c0_100, %c0_101], %125 {strides = array<i32>} : memref<1x1x4xf32, #tpu.memory_space<vmem>>, vector<1x1x4xf32>,
    return
  }
  func.func @transform_0(%arg0: i32) -> (i32, i32, i32, i32) {
    %c0_i32 = arith.constant 0 : i32
    %c0_i32_0 = arith.constant 0 : i32
    %c0_i32_1 = arith.constant 0 : i32
    %c0_i32_2 = arith.constant 0 : i32
    return %arg0, %c0_i32, %c0_i32_0, %c0_i32_1 : i32, i32, i32, i32
  }
  func.func @transform_1(%arg0: i32) -> (i32, i32) {
    %c0_i32 = arith.constant 0 : i32
    %c0_i32_0 = arith.constant 0 : i32
    %c0_i32_1 = arith.constant 0 : i32
    return %c0_i32, %c0_i32_0 : i32, i32
  }
  func.func @transform_2(%arg0: i32) -> (i32, i32, i32) {
    %c0_i32 = arith.constant 0 : i32
    %c0_i32_0 = arith.constant 0 : i32
    %c0_i32_1 = arith.constant 0 : i32
    %c0_i32_2 = arith.constant 0 : i32
    return %c0_i32, %c0_i32_0, %c0_i32_1 : i32, i32, i32
  }
  func.func @transform_3(%arg0: i32) -> (i32, i32, i32, i32, i32) {
    %c0_i32 = arith.constant 0 : i32
    %c0_i32_0 = arith.constant 0 : i32
    %c0_i32_1 = arith.constant 0 : i32
    %c0_i32_2 = arith.constant 0 : i32
    %c0_i32_3 = arith.constant 0 : i32
    return %arg0, %c0_i32, %c0_i32_0, %c0_i32_1, %c0_i32_2 : i32, i32, i32, i32, i32
  }
  func.func @transform_4(%arg0: i32) -> (i32, i32, i32) {
    %c0_i32 = arith.constant 0 : i32
    %c0_i32_0 = arith.constant 0 : i32
    %c0_i32_1 = arith.constant 0 : i32
    return %arg0, %c0_i32, %c0_i32_0 : i32, i32, i32
  }
  func.func @transform_5(%arg0: i32) -> (i32, i32, i32) {
    %c0_i32 = arith.constant 0 : i32
    %c0_i32_0 = arith.constant 0 : i32
    %c0_i32_1 = arith.constant 0 : i32
    return %arg0, %c0_i32, %c0_i32_0 : i32, i32, i32
  }
}

module attributes {stable_mosaic.version = 11 : i64} {
  func.func @_bn_apply_concat_kernel(%arg0: i32, %arg1: i32, %arg2: memref<1x1x8x8x8xf32, #tpu.memory_space<vmem>>, %arg3: memref<1x8x1x8x8xf32, #tpu.memory_space<vmem>>, %arg4: memref<1x1x8xf32, #tpu.memory_space<vmem>>, %arg5: memref<1x1x8xf32, #tpu.memory_space<vmem>>, %arg6: memref<1x8x1x8x16xf32, #tpu.memory_space<vmem>>) attributes {dimension_semantics = [#tpu.dimension_semantics<parallel>, #tpu.dimension_semantics<parallel>], iteration_bounds = array<i64: 2, 2>, scalar_prefetch = 0 : i64, scratch_operands = 0 : i64, tpu.core_type = #tpu.core_type<tc>, window_params = [{transform_indices = @transform_0, window_bounds = array<i64: 1, 1, 8, 8, 8>}, {transform_indices = @transform_1, window_bounds = array<i64: 1, 8, 1, 8, 8>}, {pipeline_mode = #tpu.pipeline_mode<synchronous>, transform_indices = @transform_2, window_bounds = array<i64: 1, 1, 8>}, {pipeline_mode = #tpu.pipeline_mode<synchronous>, transform_indices = @transform_3, window_bounds = array<i64: 1, 1, 8>}, {transform_indices = @transform_4, window_bounds = array<i64: 1, 8, 1, 8, 16>}]} {
    %c0 = arith.constant 0 : index
    %c0_0 = arith.constant 0 : index
    %c0_1 = arith.constant 0 : index
    %c0_2 = arith.constant 0 : index
    %c0_3 = arith.constant 0 : index
    %0 = vector.load %arg2[%c0, %c0_0, %c0_1, %c0_2, %c0_3] : memref<1x1x8x8x8xf32, #tpu.memory_space<vmem>>, vector<1x1x8x8x8xf32>
    %1 = vector.shape_cast %0 : vector<1x1x8x8x8xf32> to vector<8x8x8xf32>
    %c0_4 = arith.constant 0 : index
    %c0_5 = arith.constant 0 : index
    %c0_6 = arith.constant 0 : index
    %2 = vector.load %arg4[%c0_4, %c0_5, %c0_6] : memref<1x1x8xf32, #tpu.memory_space<vmem>>, vector<1x1x8xf32>
    %3 = vector.broadcast %2 : vector<1x1x8xf32> to vector<8x8x8xf32>
    %4 = arith.mulf %1, %3 : vector<8x8x8xf32>
    %c0_7 = arith.constant 0 : index
    %c0_8 = arith.constant 0 : index
    %c0_9 = arith.constant 0 : index
    %5 = vector.load %arg5[%c0_7, %c0_8, %c0_9] : memref<1x1x8xf32, #tpu.memory_space<vmem>>, vector<1x1x8xf32>
    %6 = vector.broadcast %5 : vector<1x1x8xf32> to vector<8x8x8xf32>
    %7 = arith.addf %4, %6 : vector<8x8x8xf32>
    %c0_10 = arith.constant 0 : index
    %c0_11 = arith.constant 0 : index
    %c0_12 = arith.constant 0 : index
    %c0_13 = arith.constant 0 : index
    %c0_14 = arith.constant 0 : index
    %8 = vector.load %arg3[%c0_10, %c0_11, %c0_12, %c0_13, %c0_14] : memref<1x8x1x8x8xf32, #tpu.memory_space<vmem>>, vector<1x8x1x8x8xf32>
    %9 = vector.shape_cast %8 : vector<1x8x1x8x8xf32> to vector<8x8x8xf32>
    %10 = vector.extract_strided_slice %9 {offsets = [0, 0, 0], sizes = [8, 8, 4], strides = [1, 1, 1]} : vector<8x8x8xf32> to vector<8x8x4xf32>
    %11 = vector.extract_strided_slice %7 {offsets = [0, 0, 0], sizes = [8, 8, 4], strides = [1, 1, 1]} : vector<8x8x8xf32> to vector<8x8x4xf32>
    %12 = vector.extract_strided_slice %9 {offsets = [0, 0, 4], sizes = [8, 8, 4], strides = [1, 1, 1]} : vector<8x8x8xf32> to vector<8x8x4xf32>
    %13 = vector.extract_strided_slice %7 {offsets = [0, 0, 4], sizes = [8, 8, 4], strides = [1, 1, 1]} : vector<8x8x8xf32> to vector<8x8x4xf32>
    %14 = tpu.concatenate %10, %11, %12, %13 in 2 : vector<8x8x4xf32>, vector<8x8x4xf32>, vector<8x8x4xf32>, vector<8x8x4xf32> -> vector<8x8x16xf32>
    %c0_15 = arith.constant 0 : index
    %c0_16 = arith.constant 0 : index
    %c0_17 = arith.constant 0 : index
    %c0_18 = arith.constant 0 : index
    %c0_19 = arith.constant 0 : index
    %15 = vector.load %arg6[%c0_15, %c0_16, %c0_17, %c0_18, %c0_19] : memref<1x8x1x8x16xf32, #tpu.memory_space<vmem>>, vector<1x8x1x8x16xf32>
    %16 = vector.shape_cast %15 : vector<1x8x1x8x16xf32> to vector<8x8x16xf32>
    %17 = vector.shape_cast %14 : vector<8x8x16xf32> to vector<1x8x1x8x16xf32>
    tpu.vector_store %arg6[%c0_15, %c0_16, %c0_17, %c0_18, %c0_19], %17 {strides = array<i32>} : memref<1x8x1x8x16xf32, #tpu.memory_space<vmem>>, vector<1x8x1x8x16xf32>,
    return
  }
  func.func @transform_0(%arg0: i32, %arg1: i32) -> (i32, i32, i32, i32, i32) {
    %c0_i32 = arith.constant 0 : i32
    %c0_i32_0 = arith.constant 0 : i32
    %c0_i32_1 = arith.constant 0 : i32
    %c0_i32_2 = arith.constant 0 : i32
    return %arg0, %arg1, %c0_i32, %c0_i32_0, %c0_i32_1 : i32, i32, i32, i32, i32
  }
  func.func @transform_1(%arg0: i32, %arg1: i32) -> (i32, i32, i32, i32, i32) {
    %c0_i32 = arith.constant 0 : i32
    %c0_i32_0 = arith.constant 0 : i32
    %c0_i32_1 = arith.constant 0 : i32
    %c0_i32_2 = arith.constant 0 : i32
    return %arg0, %c0_i32, %arg1, %c0_i32_0, %c0_i32_1 : i32, i32, i32, i32, i32
  }
  func.func @transform_2(%arg0: i32, %arg1: i32) -> (i32, i32, i32) {
    %c0_i32 = arith.constant 0 : i32
    %c0_i32_0 = arith.constant 0 : i32
    %c0_i32_1 = arith.constant 0 : i32
    %c0_i32_2 = arith.constant 0 : i32
    return %c0_i32, %c0_i32_0, %c0_i32_1 : i32, i32, i32
  }
  func.func @transform_3(%arg0: i32, %arg1: i32) -> (i32, i32, i32) {
    %c0_i32 = arith.constant 0 : i32
    %c0_i32_0 = arith.constant 0 : i32
    %c0_i32_1 = arith.constant 0 : i32
    %c0_i32_2 = arith.constant 0 : i32
    return %c0_i32, %c0_i32_0, %c0_i32_1 : i32, i32, i32
  }
  func.func @transform_4(%arg0: i32, %arg1: i32) -> (i32, i32, i32, i32, i32) {
    %c0_i32 = arith.constant 0 : i32
    %c0_i32_0 = arith.constant 0 : i32
    %c0_i32_1 = arith.constant 0 : i32
    %c0_i32_2 = arith.constant 0 : i32
    return %arg0, %c0_i32, %arg1, %c0_i32_0, %c0_i32_1 : i32, i32, i32, i32, i32
  }
}

</mosaic_0001>

<bundles_post_ra>
// kernel: tile.18
= control target key start
LH: loop header
LB: loop body
LE: loop exit
PB: predicated region body
PF: predicated region fallthrough
CT: control target
= control target key end

     0   :  { %s22_s0 = inlined_call_operand.vmem [shape: f32[4], index: 0, kind: input, shape index: {}]   ;;  %s23_s1 = inlined_call_operand.vmem [shape: f32[2,4], index: 1, kind: output, shape index: {}]  }
   0x1   :  { %v4_v0 = vld [vmem:[%s22_s0] ss:$0 sm:$0xff] }
   0x2   :  { %5 = vst [vmem:[%s23_s1] sm:$0x3] %v4_v0 }

// kernel: tile.19
= control target key start
LH: loop header
LB: loop body
LE: loop exit
PB: predicated region body
PF: predicated region fallthrough
CT: control target
= control target key end

     0   :  { %vm7_vm0 = vcmask 31744   ;;  %vm13_vm1 = vcmask 64544   ;;  %s39_s0 = inlined_call_operand.vmem [shape: f32[2,4], index: 0, kind: input, shape index: {}]   ;;  %s40_s1 = inlined_call_operand.vmem [shape: f32[1,1,8], index: 1, kind: output, shape index: {}]  }
   0x1   :  { %v4_v0 = vld [vmem:[%s39_s0] sm:$0x3]  ;;  %s22_s0 = smov 4  }
   0x2   :  { %5 = vst [vmem:[#allocation1] sm:$0x3] %v4_v0 }
   0x9   :  { %v10_v1 = vld [vmem:[#allocation1 + $0x1] sm:$0x1]   ;;  %v6_v2 = vld [vmem:[#allocation1] sm:$0x1]  }
   0xa   :  { %11 = vrot.lane.b32.xlu0 %v10_v1, %s22_s0  ;;  %8 = vst.msk [vmem:[#allocation0] sm:$0x1] %vm7_vm0, %v6_v2  }
  0x7c   :  { %v12_v3 = vpop.permute.xlu0 %11  }
  0x7d   :  { %14 = vst.msk [vmem:[#allocation0] sm:$0x1] %vm13_vm1, %v12_v3  }
  0x84   :  { %v17_v4 = vld [vmem:[#allocation0] sm:$0x1] }
  0x85   :  { %20 = vst [vmem:[%s40_s1] sm:$0x1] %v17_v4 }

// kernel: unet_innermost_block.3
= control target key start
LH: loop header
LB: loop body
LE: loop exit
PB: predicated region body
PF: predicated region fallthrough
CT: control target
= control target key end

     0   :  { %s797_s15 = smov 0   ;;  %s799_s16 = smov 0   ;;  %s992_s0 = inlined_call_operand.vmem [shape: f32[2,2,8,8,8], index: 0, kind: input, shape index: {}]   ;;  %s993_s1 = inlined_call_operand.vmem [shape: f32[2,8,2,8,8], index: 1, kind: input, shape index: {}]   ;;  %s994_s2 = inlined_call_operand.vmem [shape: f32[1,1,8], index: 2, kind: input, shape index: {}]   ;;  %s995_s3 = inlined_call_operand.vmem [shape: f32[1,1,8], index: 3, kind: input, shape index: {}]   ;;  %s996_s4 = inlined_call_operand.vmem [shape: f32[2,8,2,8,16], index: 4, kind: output, shape index: {}]  }
   0x1   :  { %s801_s17 = smov 0   ;;  %s803_s18 = smov 0  }
   0x2   :  { %s805_s19 = smov 0   ;;  %s807_s20 = smov 0  }
   0x3   :  { %s809_s21 = smov 0  }
   0x4 LB: > { %s23_s22 = sadd.s32 1, %s760_s19  ;;  %s26_s23 = sadd.s32 1, %s764_s20  ;;  %s768_s21 = sphi %s809_s21, %s14_s21   ;;  %s764_s20 = sphi %s807_s20, %s1003_s20   ;;  %s760_s19 = sphi %s805_s19, %s1002_s19   ;;  %s756_s18 = sphi %s803_s18, %s1001_s18   ;;  %s752_s17 = sphi %s801_s17, %s1000_s17   ;;  %s748_s16 = sphi %s799_s16, %s999_s16   ;;  %s744_s15 = sphi %s797_s15, %s998_s15  }
   0x5   : > { %p24_p0 = scmp.ge.s32.totalorder %s23_s22, 2  ;;  %s636_s24 = sadd.s32 4294967295, %s768_s21  }
   0x6   : > { %p70_p1 = scmp.ne.s32.totalorder %s748_s16, %s744_s15  ;;  %p71_p2 = scmp.eq.s32.totalorder %s768_s21, 0 }
   0x7   : > { %s1005_s22 = smov (%p24_p0, %s23_s22), 0  ;;  %s1007_s23 = smov (!%p24_p0, %s26_s23), %s764_s20 }
   0x8   : > { %p28_p3 = scmp.ge.s32.totalorder %s1007_s23, 2  ;;  %p144_p4 = scmp.eq.s32.totalorder %s636_s24, 3 }
   0x9   : > { %s59_s25 = ssub.s32 %s760_s19, %s1005_s22  ;;  %p72_p5 = por %p71_p2, %p70_p1 }
   0xa   : > { %s1009_s23 = smov (%p28_p3, %s1007_s23), 0  ;;  %p845_p6 = por %p144_p4, %p70_p1 }
   0xb   : > { %s58_s27 = ssub.s32 %s764_s20, %s1009_s23  ;;  %s63_s29 = sadd.s32 1, %s748_s16 }
   0xc   : > { %s60_s28 = sor.u32 %s59_s25, %s58_s27  ;;  %p639_p8 = scmp.ge.s32.totalorder %s768_s21, 4 }
   0xd   : > { %p61_p7 = scmp.eq.s32.totalorder %s60_s28, 0 }
   0xe   : > { %172 = sbr.rel (%p639_p8) target bundleno = 33 (0x21), region = 24 }
   0xf   : > { %s853_s30 = scalar_select %p61_p7, %s748_s16, %s63_s29  }
  0x13   : > { %187 = sbr.rel (!%p72_p5) target bundleno = 33 (0x21), region = 32  ;;  %s189_s5 = sand.u32 (%p72_p5), 1, %s748_s16  }
  0x14   : > { %s641_s6 = sshll.u32 (%p72_p5), %s764_s20, 4  ;;  %s640_s7 = sshll.u32 (%p72_p5), %s189_s5, 6 }
  0x15   : > { %s193_s8 = sadd.s32 (%p72_p5), %s760_s19, %s641_s6  ;;  %s191_s13 = scalar_lea.vmem (%p72_p5), [#allocation2], %s640_s7 }
  0x16   : > { %s642_s9 = sshll.u32 (%p72_p5), %s193_s8, 3 }
  0x17   : > { %s195_s12 = scalar_lea.vmem (%p72_p5), %s993_s1, %s642_s9 }
  0x18   : > { %v238_v0 = vld [vmem:[%s195_s12] sm:$0xff]  ;;  %v240_v1 = vld [vmem:[%s195_s12 + $0x10] sm:$0xff] }
  0x19   : > { %v242_v2 = vld [vmem:[%s195_s12 + $0x20] sm:$0xff]  ;;  %239 = vst [vmem:[%s191_s13] sm:$0xff] %v238_v0  ;;  %v244_v3 = vld [vmem:[%s195_s12 + $0x30] sm:$0xff] }
  0x1a   : > { %241 = vst [vmem:[%s191_s13 + $0x8] sm:$0xff] %v240_v1  ;;  %v246_v4 = vld [vmem:[%s195_s12 + $0x40] sm:$0xff]  ;;  %v248_v5 = vld [vmem:[%s195_s12 + $0x50] sm:$0xff] }
  0x1b   : > { %243 = vst [vmem:[%s191_s13 + $0x10] sm:$0xff] %v242_v2  ;;  %v250_v6 = vld [vmem:[%s195_s12 + $0x60] sm:$0xff]  ;;  %v252_v7 = vld [vmem:[%s195_s12 + $0x70] sm:$0xff] }
  0x1c   : > { %245 = vst [vmem:[%s191_s13 + $0x18] sm:$0xff] %v244_v3 }
  0x1d   : > { %247 = vst [vmem:[%s191_s13 + $0x20] sm:$0xff] %v246_v4 }
  0x1e   : > { %249 = vst [vmem:[%s191_s13 + $0x28] sm:$0xff] %v248_v5 }
  0x1f   : > { %251 = vst [vmem:[%s191_s13 + $0x30] sm:$0xff] %v250_v6 }
  0x20   : > { %253 = vst [vmem:[%s191_s13 + $0x38] sm:$0xff] %v252_v7 }
  0x21 PF: > { %p643_p9 = scmp.ge.s32.totalorder %s768_s21, 1  ;;  %p258_p10 = scmp.lt.s32.totalorder %s768_s21, 5 }
  0x23   : > { %p259_p11 = pnand %p643_p9, %p258_p10 }
  0x24   : > { %p298_p12 = scmp.lt.s32.totalorder (!%p259_p11), %s756_s18, 1  ;;  %p300_p13 = scmp.lt.s32.totalorder (!%p259_p11), %s752_s17, 1 }
  0x25   : > { %262 = sbr.rel (%p259_p11) target bundleno = 236 (0xec), region = 70  ;;  %s770_s12 = smov (!%p259_p11), 4  }
  0x26   : > { %s265_s13 = sand.u32 (!%p259_p11), 1, %s744_s15   ;;  %s771_s15 = smov (!%p259_p11), 8  }
  0x2a   : > { %s299_s14 = scalar_select %p298_p12, %s756_s18, 1  ;;  %v712_v8 = vld [vmem:[%s994_s2] ss:$0 sm:$0xff]  ;;  %vm435_vm0 = vcmask 31744   ;;  %vm453_vm1 = vcmask 97280   ;;  %vm444_vm2 = vcmask 64512  }
  0x2b   : > { %s301_s24 = scalar_select %p300_p13, %s752_s17, 1  ;;  %v713_v9 = vld [vmem:[%s995_s3] ss:$0 sm:$0xff]  ;;  %vm462_vm3 = vcmask 130048  }
  0x2c   : > { %s647_s25 = sshll.u32 %s299_s14, 4  ;;  %s883_s14 = sshll.u32 %s265_s13, 6 }
  0x2d   : > { %s646_s27 = sshll.u32 %s301_s24, 3  ;;  %s267_s24 = scalar_lea.vmem [#allocation2], %s883_s14 }
  0x2e   : > { %s304_s28 = sadd.s32 %s647_s25, %s646_s27  ;;  %v339_v34 = vld [vmem:[%s267_s24] sm:$0xff]  ;;  %v890_v35 = vld [vmem:[%s267_s24 + $0x10] sm:$0xff]  ;;  %v340_v36 = vld [vmem:[%s267_s24 + $0x8] sm:$0xff]  ;;  %s913_s25 = scalar_lea.vmem [#allocation3], %s883_s14 }
  0x2f   : > { %s648_s6 = sshll.u32 %s304_s28, 3  ;;  %v892_v37 = vld [vmem:[%s267_s24 + $0x18] sm:$0xff]  ;;  %v899_v38 = vld [vmem:[%s267_s24 + $0x28] sm:$0xff]  ;;  %v343_v39 = vld [vmem:[%s267_s24 + $0x20] sm:$0xff]  ;;  %s650_s27 = sshll.u32 (%p845_p6), %s756_s18, 4 }
  0x30   : > { %s306_s9 = scalar_lea.vmem %s992_s0, %s648_s6  ;;  %v901_v40 = vld [vmem:[%s267_s24 + $0x30] sm:$0xff]  ;;  %v346_v41 = vld [vmem:[%s267_s24 + $0x38] sm:$0xff]  ;;  %s479_s28 = sadd.s32 (%p845_p6), %s752_s17, %s650_s27 }
  0x31   : > { %v309_v10 = vld [vmem:[%s306_s9 + $0x10] sm:$0xff]  ;;  %v307_v11 = vld [vmem:[%s306_s9] sm:$0xff]  ;;  %v310_v15 = vld [vmem:[%s306_s9 + $0x18] sm:$0xff]  ;;  %s651_s29 = sshll.u32 (%p845_p6), %s479_s28, 3 }
  0x32   : > { %v321_v12 = vmul.f32 %v712_v8, %v309_v10  ;;  %v319_v13 = vmul.f32 %v712_v8, %v307_v11  ;;  %v311_v14 = vld [vmem:[%s306_s9 + $0x20] sm:$0xff]  ;;  %v308_v16 = vld [vmem:[%s306_s9 + $0x8] sm:$0xff]  ;;  %v322_v22 = vmul.f32 %v712_v8, %v310_v15  ;;  %v314_v27 = vld [vmem:[%s306_s9 + $0x38] sm:$0xff]  ;;  %s481_s26 = scalar_lea.vmem (%p845_p6), %s996_s4, %s651_s29 }
  0x33   : > { %v323_v17 = vmul.f32 %v712_v8, %v311_v14  ;;  %v312_v20 = vld [vmem:[%s306_s9 + $0x28] sm:$0xff]  ;;  %v320_v23 = vmul.f32 %v712_v8, %v308_v16  ;;  %v313_v28 = vld [vmem:[%s306_s9 + $0x30] sm:$0xff]  ;;  %v326_v30 = vmul.f32 %v712_v8, %v314_v27 }
  0x34   : > { %v333_v18 = vadd.f32 %v713_v9, %v321_v12  ;;  %v331_v19 = vadd.f32 %v713_v9, %v319_v13  ;;  %v324_v24 = vmul.f32 %v712_v8, %v312_v20  ;;  %v334_v25 = vadd.f32 %v713_v9, %v322_v22 }
  0x35   : > { %v335_v21 = vadd.f32 %v713_v9, %v323_v17  ;;  %v332_v26 = vadd.f32 %v713_v9, %v320_v23  ;;  %v325_v31 = vmul.f32 %v712_v8, %v313_v28  ;;  %v338_v32 = vadd.f32 %v713_v9, %v326_v30 }
  0x36   : > { %359 = vrot.lane.b32.xlu1 %v333_v18, %s770_s12  ;;  %355 = vrot.lane.b32.xlu0 %v331_v19, %s770_s12  ;;  %v336_v29 = vadd.f32 %v713_v9, %v324_v24 }
  0x37   : > { %363 = vrot.lane.b32.xlu2 %v335_v21, %s770_s12  ;;  %v337_v33 = vadd.f32 %v713_v9, %v325_v31 }
  0x3e   : > { %361 = vrot.lane.b32.xlu1 %v334_v25, %s770_s12  ;;  %357 = vrot.lane.b32.xlu0 %v332_v26, %s770_s12 }
  0x3f   : > { %365 = vrot.lane.b32.xlu2 %v336_v29, %s770_s12 }
  0x46   : > { %369 = vrot.lane.b32.xlu1 %v338_v32, %s770_s12  ;;  %367 = vrot.lane.b32.xlu0 %v337_v33, %s770_s12 }
  0x47   : > { %387 = vrot.lane.b32.xlu2 %v339_v34, %s770_s12 }
  0x4e   : > { %391 = vrot.lane.b32.xlu1 %v890_v35, %s770_s12  ;;  %389 = vrot.lane.b32.xlu0 %v340_v36, %s770_s12 }
  0x4f   : > { %393 = vrot.lane.b32.xlu2 %v892_v37, %s770_s12 }
  0x56   : > { %397 = vrot.lane.b32.xlu1 %v899_v38, %s770_s12  ;;  %395 = vrot.lane.b32.xlu0 %v343_v39, %s770_s12 }
  0x57   : > { %399 = vrot.lane.b32.xlu2 %v901_v40, %s770_s12 }
  0x5e   : > { %411 = vrot.lane.b32.xlu1 %v331_v19, %s771_s15  ;;  %401 = vrot.lane.b32.xlu0 %v346_v41, %s770_s12 }
  0x5f   : > { %413 = vrot.lane.b32.xlu2 %v332_v26, %s771_s15 }
  0x66   : > { %417 = vrot.lane.b32.xlu1 %v334_v25, %s771_s15  ;;  %415 = vrot.lane.b32.xlu0 %v333_v18, %s771_s15 }
  0x67   : > { %419 = vrot.lane.b32.xlu2 %v335_v21, %s771_s15 }
  0x6e   : > { %423 = vrot.lane.b32.xlu1 %v337_v33, %s771_s15  ;;  %421 = vrot.lane.b32.xlu0 %v336_v29, %s771_s15 }
  0x6f   : > { %425 = vrot.lane.b32.xlu2 %v338_v32, %s771_s15 }
  0x91   : > { %v364_v42 = vpop.permute.xlu2 %363 }
  0x92   : > { %v440_v60 = vsel %vm435_vm0, %v343_v39, %v364_v42 }
  0x99   : > { %v366_v43 = vpop.permute.xlu2 %365 }
  0x9a   : > { %v441_v19 = vsel %vm435_vm0, %v899_v38, %v366_v43 }
  0xa1   : > { %v388_v44 = vpop.permute.xlu2 %387 }
  0xa8   : > { %v360_v45 = vpop.permute.xlu1 %359  ;;  %v356_v46 = vpop.permute.xlu0 %355 }
  0xa9   : > { %v394_v47 = vpop.permute.xlu2 %393  ;;  %v436_v1 = vsel %vm435_vm0, %v339_v34, %v356_v46  ;;  %v438_v11 = vsel %vm435_vm0, %v890_v35, %v360_v45 }
  0xaa   : > { %v445_v3 = vsel %vm444_vm2, %v436_v1, %v388_v44 }
  0xb0   : > { %v362_v48 = vpop.permute.xlu1 %361  ;;  %v358_v49 = vpop.permute.xlu0 %357 }
  0xb1   : > { %v400_v50 = vpop.permute.xlu2 %399  ;;  %v437_v54 = vsel %vm435_vm0, %v340_v36, %v358_v49  ;;  %v439_v10 = vsel %vm435_vm0, %v892_v37, %v362_v48 }
  0xb2   : > { %v448_v12 = vsel %vm444_vm2, %v439_v10, %v394_v47 }
  0xb8   : > { %v370_v51 = vpop.permute.xlu1 %369  ;;  %v368_v52 = vpop.permute.xlu0 %367 }
  0xb9   : > { %v414_v53 = vpop.permute.xlu2 %413  ;;  %v443_v4 = vsel %vm435_vm0, %v346_v41, %v370_v51  ;;  %v442_v18 = vsel %vm435_vm0, %v901_v40, %v368_v52 }
  0xba   : > { %v451_v20 = vsel %vm444_vm2, %v442_v18, %v400_v50 }
  0xc0   : > { %v392_v55 = vpop.permute.xlu1 %391  ;;  %v390_v56 = vpop.permute.xlu0 %389 }
  0xc1   : > { %v446_v57 = vsel %vm444_vm2, %v437_v54, %v390_v56  ;;  %v420_v59 = vpop.permute.xlu2 %419  ;;  %v447_v13 = vsel %vm444_vm2, %v438_v11, %v392_v55 }
  0xc2   : > { %v455_v58 = vsel %vm453_vm1, %v446_v57, %v414_v53 }
  0xc3   : > { %464 = vst.msk [vmem:[%s913_s25 + $0x8] sm:$0xff] %vm462_vm3, %v455_v58 }
  0xc8   : > { %v398_v61 = vpop.permute.xlu1 %397  ;;  %v396_v62 = vpop.permute.xlu0 %395 }
  0xc9   : > { %v449_v63 = vsel %vm444_vm2, %v440_v60, %v396_v62  ;;  %v426_v2 = vpop.permute.xlu2 %425  ;;  %v450_v21 = vsel %vm444_vm2, %v441_v19, %v398_v61 }
  0xca   : > { %v458_v0 = vsel %vm453_vm1, %v449_v63, %v420_v59  ;;  %v526_v27 = vld [vmem:[%s913_s25 + $0x8] sm:$0xff] (%p845_p6) }
  0xcb   : > { %467 = vst.msk [vmem:[%s913_s25 + $0x20] sm:$0xff] %vm462_vm3, %v458_v0 }
  0xcc   : > { %527 = vst [vmem:[%s481_s26 + $0x10] sm:$0xff] (%p845_p6), %v526_v27 }
  0xd0   : > { %v412_v5 = vpop.permute.xlu1 %411  ;;  %v402_v6 = vpop.permute.xlu0 %401 }
  0xd1   : > { %v454_v7 = vsel %vm453_vm1, %v445_v3, %v412_v5  ;;  %v452_v8 = vsel %vm444_vm2, %v443_v4, %v402_v6 }
  0xd2   : > { %463 = vst.msk [vmem:[%s913_s25] sm:$0xff] %vm462_vm3, %v454_v7  ;;  %v461_v9 = vsel %vm453_vm1, %v452_v8, %v426_v2  ;;  %v532_v30 = vld [vmem:[%s913_s25 + $0x20] sm:$0xff] (%p845_p6) }
  0xd3   : > { %470 = vst.msk [vmem:[%s913_s25 + $0x38] sm:$0xff] %vm462_vm3, %v461_v9 }
  0xd4   : > { %533 = vst [vmem:[%s481_s26 + $0x40] sm:$0xff] (%p845_p6), %v532_v30 }
  0xd8   : > { %v418_v14 = vpop.permute.xlu1 %417  ;;  %v416_v15 = vpop.permute.xlu0 %415 }
  0xd9   : > { %v457_v16 = vsel %vm453_vm1, %v448_v12, %v418_v14  ;;  %v456_v17 = vsel %vm453_vm1, %v447_v13, %v416_v15  ;;  %v524_v26 = vld [vmem:[%s913_s25] sm:$0xff] (%p845_p6) }
  0xda   : > { %466 = vst.msk [vmem:[%s913_s25 + $0x18] sm:$0xff] %vm462_vm3, %v457_v16  ;;  %v538_v33 = vld [vmem:[%s913_s25 + $0x38] sm:$0xff] (%p845_p6) }
  0xdb   : > { %465 = vst.msk [vmem:[%s913_s25 + $0x10] sm:$0xff] %vm462_vm3, %v456_v17 }
  0xdc   : > { %525 = vst [vmem:[%s481_s26] sm:$0xff] (%p845_p6), %v524_v26 }
  0xdd   : > { %539 = vst [vmem:[%s481_s26 + $0x70] sm:$0xff] (%p845_p6), %v538_v33 }
  0xdf   : > { %477 = sbr.rel (!%p845_p6) target bundleno = 236 (0xec), region = 78 }
  0xe0   : > { %v424_v22 = vpop.permute.xlu1 %423  ;;  %v422_v23 = vpop.permute.xlu0 %421 }
  0xe1   : > { %v460_v24 = vsel %vm453_vm1, %v451_v20, %v424_v22  ;;  %v459_v25 = vsel %vm453_vm1, %v450_v21, %v422_v23  ;;  %v530_v29 = vld [vmem:[%s913_s25 + $0x18] sm:$0xff] (%p845_p6) }
  0xe2   : > { %469 = vst.msk [vmem:[%s913_s25 + $0x30] sm:$0xff] %vm462_vm3, %v460_v24  ;;  %v528_v28 = vld [vmem:[%s913_s25 + $0x10] sm:$0xff] (%p845_p6) }
  0xe3   : > { %468 = vst.msk [vmem:[%s913_s25 + $0x28] sm:$0xff] %vm462_vm3, %v459_v25 }
  0xe4   : > { %529 = vst [vmem:[%s481_s26 + $0x20] sm:$0xff] %v528_v28 }
  0xe5   : > { %531 = vst [vmem:[%s481_s26 + $0x30] sm:$0xff] %v530_v29 }
  0xe9   : > { %v536_v32 = vld [vmem:[%s913_s25 + $0x30] sm:$0xff] }
  0xea   : > { %v534_v31 = vld [vmem:[%s913_s25 + $0x28] sm:$0xff]  ;;  %537 = vst [vmem:[%s481_s26 + $0x60] sm:$0xff] %v536_v32 }
  0xeb   : > { %535 = vst [vmem:[%s481_s26 + $0x50] sm:$0xff] %v534_v31 }
  0xec PF: > { %s14_s21 = sadd.s32 1, %s768_s21   ;;  %s998_s15 = smov %s748_s16 }
  0xed   : > { %p11_p0 = scmp.ge.s32.totalorder %s14_s21, 6   ;;  %s999_s16 = smov %s853_s30 }
  0xee   : > { %s1000_s17 = smov %s760_s19  ;;  %s1001_s18 = smov %s764_s20 }
  0xef   : > { %s1002_s19 = smov %s1005_s22  ;;  %s1003_s20 = smov %s1009_s23 }
  0xf0   :  { %13 = sbr.rel (!%p11_p0) target bundleno = 4 (0x4), region = 150 }

// kernel: unet_innermost_block.2
= control target key start
LH: loop header
LB: loop body
LE: loop exit
PB: predicated region body
PF: predicated region fallthrough
CT: control target
= control target key end

     0   :  { %s2296_s18 = smov 0   ;;  %s3131_s0 = inlined_call_operand.vmem [shape: bf16[2,9,9,16], index: 0, kind: input, shape index: {}]   ;;  %s3132_s1 = inlined_call_operand.vmem [shape: bf16[64,8], index: 1, kind: input, shape index: {}]   ;;  %s3133_s2 = inlined_call_operand.vmem [shape: bf16[4,32,4], index: 2, kind: input, shape index: {}]   ;;  %s3134_s3 = inlined_call_operand.vmem [shape: f32[2,2,8,8,8], index: 3, kind: output, shape index: {0}]   ;;  %s3135_s4 = inlined_call_operand.vmem [shape: f32[2,1,4], index: 4, kind: output, shape index: {1}]   ;;  %s3136_s5 = inlined_call_operand.vmem [shape: f32[2,1,4], index: 5, kind: output, shape index: {2}]  }
   0x1 LB: > { %s1818_s19 = sadd.s32 4294967295, %s2257_s18   ;;  %p1822_p0 = scmp.ge.s32.totalorder %s2257_s18, 1  ;;  %s2257_s18 = sphi %s2296_s18, %s16_s18  }
   0x2   : > { %p192_p1 = scmp.lt.s32.totalorder %s2257_s18, 3 }
   0x4   : > { %p193_p2 = pnand %p1822_p0, %p192_p1 }
   0x5   : > { %p226_p3 = scmp.lt.s32.totalorder (!%p193_p2), %s1818_s19, 1  ;;  %s2259_s26 = smov (!%p193_p2), 16  }
   0x6   : > { %196 = sbr.rel (%p193_p2) target bundleno = 794 (0x31a), region = 32  ;;  %s2260_s27 = smov (!%p193_p2), 48  }
   0x7   : > { %s2261_s28 = smov (!%p193_p2), 32   ;;  %s2263_s10 = smov (!%p193_p2), 8  }
   0x8   : > { %s2264_s11 = smov (!%p193_p2), 24   ;;  %s2265_s30 = smov (!%p193_p2), 4  }
   0xb   : > { %s3138_s19 = smov (!%p226_p3, %s1818_s19), 1  ;;  %vm349_vm0 = vcmask 1046528   ;;  %v1920_v41 = vld [vmem:[%s3132_s1 + $0x18] sm:$0xff] }
   0xc   : > { %s1935_s20 = smul.u32 72, %s3138_s19  ;;  %531 = vmatpush.bf16.msra.mxu0 %v1920_v41  ;;  %s1916_s6 = sshll.u32 %s3138_s19, 7 }
   0xd   : > { %s3054_s9 = scalar_lea.vmem %s3134_s3, %s1916_s6  ;;  %s238_s12 = scalar_lea.vmem %s3135_s4, %s3138_s19 }
   0xe   : > { %s2310_s23 = scalar_lea.vmem %s3131_s0, %s1935_s20  ;;  %s241_s15 = scalar_lea.vmem %s3136_s5, %s3138_s19 }
   0xf   : > { %v243_v0 = vld [vmem:[%s2310_s23] sm:$0xf]  ;;  %v244_v1 = vld [vmem:[%s2310_s23 + $0x4] sm:$0x1]  ;;  %v245_v2 = vld [vmem:[%s2310_s23 + $0x8] sm:$0xf] }
  0x10   : > { %v246_v3 = vld [vmem:[%s2310_s23 + $0xc] sm:$0x1]  ;;  %v261_v4 = vunpack.c.l.bf16 %v243_v0  ;;  %v262_v5 = vunpack.c.l.bf16 %v244_v1  ;;  %v263_v6 = vunpack.c.l.bf16 %v245_v2  ;;  %v247_v7 = vld [vmem:[%s2310_s23 + $0x10] sm:$0xf]  ;;  %v248_v8 = vld [vmem:[%s2310_s23 + $0x14] sm:$0x1] }
  0x11   : > { %v264_v9 = vunpack.c.l.bf16 %v246_v3  ;;  %v265_v10 = vunpack.c.l.bf16 %v247_v7  ;;  %v249_v11 = vld [vmem:[%s2310_s23 + $0x18] sm:$0xf]  ;;  %v250_v12 = vld [vmem:[%s2310_s23 + $0x1c] sm:$0x1]  ;;  %v266_v13 = vunpack.c.l.bf16 %v248_v8  ;;  %v251_v29 = vld [vmem:[%s2310_s23 + $0x20] sm:$0xf] }
  0x12   : > { %vm279_vm1 = vcmp.gt.f32.partialorder %v261_v4, 0.0  ;;  %vm280_vm2 = vcmp.gt.f32.partialorder %v262_v5, 0.0  ;;  %vm281_vm3 = vcmp.gt.f32.partialorder %v263_v6, 0.0  ;;  %v297_v14 = vmul.f32 0.2, %v261_v4 }
  0x13   : > { %vm282_vm4 = vcmp.gt.f32.partialorder %v264_v9, 0.0  ;;  %v298_v15 = vmul.f32 0.2, %v262_v5  ;;  %v299_v16 = vmul.f32 0.2, %v263_v6  ;;  %vm283_vm5 = vcmp.gt.f32.partialorder %v265_v10, 0.0 }
  0x14   : > { %v300_v17 = vmul.f32 0.2, %v264_v9  ;;  %v2320_v18 = vsel %vm279_vm1, %v261_v4, %v297_v14  ;;  %v301_v19 = vmul.f32 0.2, %v265_v10  ;;  %v267_v20 = vunpack.c.l.bf16 %v249_v11  ;;  %v252_v30 = vld [vmem:[%s2310_s23 + $0x24] sm:$0x1] }
  0x15   : > { %v316_v21 = vsel %vm280_vm2, %v262_v5, %v298_v15  ;;  %v2322_v22 = vsel %vm281_vm3, %v263_v6, %v299_v16  ;;  %v350_v23 = vrot.slane %v2320_v18, 1  ;;  %v268_v24 = vunpack.c.l.bf16 %v250_v12  ;;  %v253_v32 = vld [vmem:[%s2310_s23 + $0x28] sm:$0xf]  ;;  %v254_v40 = vld [vmem:[%s2310_s23 + $0x2c] sm:$0x1] }
  0x16   : > { %v318_v25 = vsel %vm282_vm4, %v264_v9, %v300_v17  ;;  %v351_v26 = vrot.slane %v316_v21, 1  ;;  %v353_v27 = vrot.slane %v2322_v22, 1  ;;  %v2326_v28 = vsel %vm283_vm5, %v265_v10, %v301_v19  ;;  %v255_v48 = vld [vmem:[%s2310_s23 + $0x30] sm:$0xf]  ;;  %v256_v59 = vld [vmem:[%s2310_s23 + $0x34] sm:$0x1] }
  0x17   : > { %v354_v31 = vrot.slane %v318_v25, 1  ;;  %vm284_vm6 = vcmp.gt.f32.partialorder %v266_v13, 0.0  ;;  %vm285_vm7 = vcmp.gt.f32.partialorder %v267_v20, 0.0  ;;  %vm286_vm8 = vcmp.gt.f32.partialorder %v268_v24, 0.0  ;;  %v257_v60 = vld [vmem:[%s2310_s23 + $0x38] sm:$0xf] }
  0x18   : > { %v352_v33 = vsel %vm349_vm0, %v350_v23, %v351_v26  ;;  %v302_v34 = vmul.f32 0.2, %v266_v13  ;;  %v303_v35 = vmul.f32 0.2, %v267_v20  ;;  %v304_v37 = vmul.f32 0.2, %v268_v24 }
  0x19   : > { %v355_v36 = vsel %vm349_vm0, %v353_v27, %v354_v31  ;;  %v356_v38 = vrot.slane %v2326_v28, 1  ;;  %v269_v39 = vunpack.c.l.bf16 %v251_v29  ;;  %v270_v45 = vunpack.c.l.bf16 %v252_v30  ;;  %v258_v63 = vld [vmem:[%s2310_s23 + $0x3c] sm:$0x1]  ;;  %v259_v8 = vld [vmem:[%s2310_s23 + $0x40] sm:$0xf] }
  0x1a   : > { %v1951_v42 = vpack.i.bf16 %v355_v36, %v352_v33  ;;  %v320_v43 = vsel %vm284_vm6, %v266_v13, %v302_v34  ;;  %v2338_v44 = vsel %vm285_vm7, %v267_v20, %v303_v35  ;;  %v322_v46 = vsel %vm286_vm8, %v268_v24, %v304_v37  ;;  %v260_v20 = vld [vmem:[%s2310_s23 + $0x44] sm:$0x1] }
  0x1b   : > { %v357_v47 = vrot.slane %v320_v43, 1  ;;  %vm287_vm9 = vcmp.gt.f32.partialorder %v269_v39, 0.0  ;;  %v359_v49 = vrot.slane %v2338_v44, 1  ;;  %v305_v50 = vmul.f32 0.2, %v269_v39 }
  0x1c   : > { %1952 = vrot.lane.b32.xlu0 %v1951_v42, %s2259_s26  ;;  %v271_v51 = vunpack.c.l.bf16 %v253_v32  ;;  %v272_v52 = vunpack.c.l.bf16 %v254_v40  ;;  %v360_v54 = vrot.slane %v322_v46, 1  ;;  %vm288_vm10 = vcmp.gt.f32.partialorder %v270_v45, 0.0 }
  0x1d   : > { %v358_v53 = vsel %vm349_vm0, %v356_v38, %v357_v47  ;;  %v306_v55 = vmul.f32 0.2, %v270_v45  ;;  %v2344_v57 = vsel %vm287_vm9, %v269_v39, %v305_v50  ;;  %v273_v58 = vunpack.c.l.bf16 %v255_v48 }
  0x1e   : > { %v1961_v56 = vpack.i.bf16 %v358_v53, %v355_v36  ;;  %v362_v61 = vrot.slane %v2344_v57, 1  ;;  %v1971_v62 = vpack.i.bf16 %v2344_v57, %v2338_v44  ;;  %vm289_vm11 = vcmp.gt.f32.partialorder %v271_v51, 0.0 }
  0x1f   : > { %vm290_vm12 = vcmp.gt.f32.partialorder %v272_v52, 0.0  ;;  %v1956_v0 = vpack.i.bf16 %v2326_v28, %v2322_v22  ;;  %v307_v1 = vmul.f32 0.2, %v271_v51  ;;  %v308_v2 = vmul.f32 0.2, %v272_v52 }
  0x20   : > { %1962 = vrot.lane.b32.xlu1 %v1961_v56, %s2260_s27  ;;  %v324_v3 = vsel %vm288_vm10, %v270_v45, %v306_v55  ;;  %v361_v4 = vsel %vm349_vm0, %v359_v49, %v360_v54  ;;  %1972 = vrot.lane.b32.xlu2 %v1971_v62, %s2261_s28  ;;  %v274_v6 = vunpack.c.l.bf16 %v256_v59  ;;  %v275_v7 = vunpack.c.l.bf16 %v257_v60  ;;  %v1917_v54 = vld [vmem:[%s3132_s1] sm:$0xff] }
  0x21   : > { %v363_v5 = vrot.slane %v324_v3, 1  ;;  %v2360_v9 = vsel %vm289_vm11, %v271_v51, %v307_v1  ;;  %v326_v10 = vsel %vm290_vm12, %v272_v52, %v308_v2  ;;  %v309_v11 = vmul.f32 0.2, %v273_v58  ;;  %v1919_v52 = vld [vmem:[%s3132_s1 + $0x10] sm:$0xff] }
  0x22   : > { %v276_v12 = vunpack.c.l.bf16 %v258_v63  ;;  %v365_v14 = vrot.slane %v2360_v9, 1  ;;  %v366_v15 = vrot.slane %v326_v10, 1  ;;  %vm291_vm13 = vcmp.gt.f32.partialorder %v273_v58, 0.0  ;;  %532 = vmatpush.bf16.msra.mxu0 %v1919_v52 }
  0x23   : > { %v364_v13 = vsel %vm349_vm0, %v362_v61, %v363_v5  ;;  %v1966_v16 = vpack.i.bf16 %v361_v4, %v358_v53  ;;  %vm292_vm14 = vcmp.gt.f32.partialorder %v274_v6, 0.0  ;;  %v277_v19 = vunpack.c.l.bf16 %v259_v8  ;;  %v1918_v53 = vld [vmem:[%s3132_s1 + $0x8] sm:$0xff] }
  0x24   : > { %1957 = vrot.lane.b32.xlu0 %v1956_v0, %s2261_s28  ;;  %v1976_v17 = vpack.i.bf16 %v364_v13, %v361_v4  ;;  %v367_v21 = vsel %vm349_vm0, %v365_v14, %v366_v15  ;;  %vm293_vm15 = vcmp.gt.f32.partialorder %v275_v7, 0.0  ;;  %vm294_vm1 = vcmp.gt.f32.partialorder %v276_v12, 0.0 }
  0x25   : > { %v310_v23 = vmul.f32 0.2, %v274_v6  ;;  %v2368_v24 = vsel %vm291_vm13, %v273_v58, %v309_v11  ;;  %v311_v25 = vmul.f32 0.2, %v275_v7  ;;  %v312_v26 = vmul.f32 0.2, %v276_v12 }
  0x26   : > { %v368_v27 = vrot.slane %v2368_v24, 1  ;;  %v278_v30 = vunpack.c.l.bf16 %v260_v20  ;;  %v1981_v31 = vpack.i.bf16 %v367_v21, %v364_v13  ;;  %v313_v37 = vmul.f32 0.2, %v277_v19  ;;  %533 = vmatpush.bf16.msra.mxu0 %v1918_v53 }
  0x27   : > { %v328_v29 = vsel %vm292_vm14, %v274_v6, %v310_v23  ;;  %v2372_v32 = vsel %vm293_vm15, %v275_v7, %v311_v25  ;;  %v330_v33 = vsel %vm294_vm1, %v276_v12, %v312_v26  ;;  %vm295_vm3 = vcmp.gt.f32.partialorder %v277_v19, 0.0 }
  0x28   : > { %1967 = vrot.lane.b32.xlu1 %v1966_v16, %s2259_s26  ;;  %v369_v34 = vrot.slane %v328_v29, 1  ;;  %1977 = vrot.lane.b32.xlu2 %v1976_v17, %s2260_s27  ;;  %v371_v35 = vrot.slane %v2372_v32, 1  ;;  %v372_v36 = vrot.slane %v330_v33, 1  ;;  %vm296_vm2 = vcmp.gt.f32.partialorder %v278_v30, 0.0 }
  0x29   : > { %v314_v38 = vmul.f32 0.2, %v278_v30  ;;  %v1986_v39 = vpack.i.bf16 %v2368_v24, %v2360_v9  ;;  %v331_v43 = vsel %vm295_vm3, %v277_v19, %v313_v37  ;;  %vm460_vm4 = vcmask 261120  }
  0x2a   : > { %v370_v40 = vsel %vm349_vm0, %v368_v27, %v369_v34  ;;  %v373_v42 = vsel %vm349_vm0, %v371_v35, %v372_v36  ;;  %v376_v46 = vrot.slane %v331_v43, 1  ;;  %v2001_v50 = vpack.i.bf16 %v331_v43, %v2372_v32  ;;  %534 = vmatpush.bf16.msra.mxu0 %v1917_v54 }
  0x2b   : > { %v332_v41 = vsel %vm296_vm2, %v278_v30, %v314_v38  ;;  %v1991_v45 = vpack.i.bf16 %v370_v40, %v367_v21  ;;  %v1996_v48 = vpack.i.bf16 %v373_v42, %v370_v40  ;;  %vm469_vm5 = vcmask 392192  }
  0x2c   : > { %1982 = vrot.lane.b32.xlu0 %v1981_v31, %s2259_s26  ;;  %v377_v47 = vrot.slane %v332_v41, 1  ;;  %vm514_vm6 = vcmask 523264   ;;  %vm564_vm7 = vcmask 64512   ;;  %vm566_vm8 = vcmask 58368  }
  0x2d   : > { %vm739_vm9 = vcmask 195584   ;;  %vm809_vm10 = vcmask 31744   ;;  %vm1710_vm11 = vcmask 24576  }
  0x2e   : > { %v378_v49 = vsel %vm349_vm0, %v376_v46, %v377_v47  ;;  %vm451_vm0 = vcmask 130048  }
  0x2f   : > { %v2006_v51 = vpack.i.bf16 %v378_v49, %v373_v42 }
  0x30   : > { %1987 = vrot.lane.b32.xlu1 %v1986_v39, %s2261_s28  ;;  %1992 = vrot.lane.b32.xlu2 %v1991_v45, %s2260_s27 }
  0x34   : > { %1997 = vrot.lane.b32.xlu0 %v1996_v48, %s2259_s26 }
  0x38   : > { %2002 = vrot.lane.b32.xlu1 %v2001_v50, %s2261_s28  ;;  %2007 = vrot.lane.b32.xlu2 %v2006_v51, %s2260_s27 }
  0x7a   : > { %v1973_v1 = vpop.permute.xlu2 %1972 }
  0x7b   : > { %v1975_v13 = vunpack.i.h.bf16 %v1973_v1 }
  0x82   : > { %v1978_v14 = vpop.permute.xlu2 %1977 }
  0x83   : > { %v1980_v16 = vunpack.i.h.bf16 %v1978_v14  ;;  %v1979_v17 = vunpack.i.l.bf16 %v1978_v14 }
  0x8e   : > { %v1953_v55 = vpop.permute.xlu0 %1952 }
  0x8f   : > { %v1955_v58 = vunpack.i.h.bf16 %v1953_v55  ;;  %v1954_v59 = vunpack.i.l.bf16 %v1953_v55 }
  0x91   : > { %v453_v2 = vsel %vm451_vm0, %v2322_v22, %v1955_v58  ;;  %v452_v3 = vsel %vm451_vm0, %v2320_v18, %v1954_v59  ;;  %v1974_v22 = vunpack.i.l.bf16 %v1973_v1  ;;  %v2262_v58 = vmov 0.0  }
  0x92   : > { %v1963_v56 = vpop.permute.xlu1 %1962  ;;  %568 = vst.msk [vmem:[#allocation2 + $0x10] sm:$0xff] %vm564_vm7, %v2262_v58 }
  0x93   : > { %v1965_v61 = vunpack.i.h.bf16 %v1963_v56  ;;  %v1964_v62 = vunpack.i.l.bf16 %v1963_v56  ;;  %569 = vst.msk [vmem:[#allocation2 + $0x18] sm:$0x3] %vm566_vm8, %v2262_v58 }
  0x94   : > { %565 = vst.msk [vmem:[#allocation2] sm:$0xff] %vm564_vm7, %v2262_v58 }
  0x95   : > { %567 = vst.msk [vmem:[#allocation2 + $0x8] sm:$0x3] %vm566_vm8, %v2262_v58 }
  0x96   : > { %v1958_v60 = vpop.permute.xlu0 %1957  ;;  %570 = vst.msk [vmem:[#allocation2 + $0x20] sm:$0xff] %vm564_vm7, %v2262_v58 }
  0x97   : > { %v1960_v63 = vunpack.i.h.bf16 %v1958_v60  ;;  %v1959_v0 = vunpack.i.l.bf16 %v1958_v60  ;;  %571 = vst.msk [vmem:[#allocation2 + $0x28] sm:$0x3] %vm566_vm8, %v2262_v58 }
  0x98   : > { %572 = vst.msk [vmem:[#allocation2 + $0x30] sm:$0xff] %vm564_vm7, %v2262_v58 }
  0x99   : > { %v461_v4 = vsel %vm460_vm4, %v452_v3, %v1959_v0  ;;  %v462_v5 = vsel %vm460_vm4, %v453_v2, %v1960_v63  ;;  %573 = vst.msk [vmem:[#allocation2 + $0x38] sm:$0x3] %vm566_vm8, %v2262_v58 }
  0x9a   : > { %v470_v6 = vsel %vm469_vm5, %v461_v4, %v1964_v62  ;;  %v471_v7 = vsel %vm469_vm5, %v462_v5, %v1965_v61  ;;  %v1968_v10 = vpop.permute.xlu1 %1967  ;;  %574 = vst.msk [vmem:[#allocation2 + $0x40] sm:$0xff] %vm564_vm7, %v2262_v58 }
  0x9b   : > { %v478_v8 = vpack.c.bf16 %v471_v7, %v470_v6  ;;  %v1970_v11 = vunpack.i.h.bf16 %v1968_v10  ;;  %v1969_v12 = vunpack.i.l.bf16 %v1968_v10  ;;  %575 = vst.msk [vmem:[#allocation2 + $0x48] sm:$0x3] %vm566_vm8, %v2262_v58 }
  0x9c   : > { %576 = vst.msk [vmem:[#allocation2 + $0x50] sm:$0xff] %vm564_vm7, %v2262_v58  ;;  %v862_v60 = vld [vmem:[#allocation2 + $0x2] sm:$0xff] }
  0x9d   : > { %1842 = vmatmul.msk.bf16.vlgmr.msra.gmra.mxu0 %vm514_vm6, %v478_v8  ;;  %v455_v18 = vsel %vm451_vm0, %v2338_v44, %v1970_v11  ;;  %v454_v15 = vsel %vm451_vm0, %v2326_v28, %v1969_v12  ;;  %v1993_v28 = vpop.permute.xlu2 %1992  ;;  %577 = vst.msk [vmem:[#allocation2 + $0x58] sm:$0x3] %vm566_vm8, %v2262_v58  ;;  %v2454_v61 = vld [vmem:[#allocation2 + $0x1] sm:$0xff] }
  0x9e   : > { %v463_v19 = vsel %vm460_vm4, %v454_v15, %v1974_v22  ;;  %v464_v20 = vsel %vm460_vm4, %v455_v18, %v1975_v13  ;;  %v1983_v25 = vpop.permute.xlu0 %1982  ;;  %v1995_v35 = vunpack.i.h.bf16 %v1993_v28  ;;  %v1994_v36 = vunpack.i.l.bf16 %v1993_v28  ;;  %578 = vst.msk [vmem:[#allocation2 + $0x60] sm:$0xff] %vm564_vm7, %v2262_v58 }
  0x9f   : > { %v472_v21 = vsel %vm469_vm5, %v463_v19, %v1979_v17  ;;  %v473_v23 = vsel %vm469_vm5, %v464_v20, %v1980_v16  ;;  %v1985_v27 = vunpack.i.h.bf16 %v1983_v25  ;;  %v1984_v29 = vunpack.i.l.bf16 %v1983_v25  ;;  %579 = vst.msk [vmem:[#allocation2 + $0x68] sm:$0x3] %vm566_vm8, %v2262_v58 }
  0xa0   : > { %v479_v26 = vpack.c.bf16 %v473_v23, %v472_v21  ;;  %580 = vst.msk [vmem:[#allocation2 + $0x70] sm:$0xff] %vm564_vm7, %v2262_v58 }
  0xa1   : > { %v457_v33 = vsel %vm451_vm0, %v2360_v9, %v1985_v27  ;;  %v456_v34 = vsel %vm451_vm0, %v2344_v57, %v1984_v29  ;;  %581 = vst.msk [vmem:[#allocation2 + $0x78] sm:$0x3] %vm566_vm8, %v2262_v58 }
  0xa2   : > { %v1988_v30 = vpop.permute.xlu1 %1987  ;;  %582 = vst.msk [vmem:[#allocation2 + $0x80] sm:$0xff] %vm564_vm7, %v2262_v58 }
  0xa3   : > { %v1990_v44 = vunpack.i.h.bf16 %v1988_v30  ;;  %v1989_v31 = vunpack.i.l.bf16 %v1988_v30  ;;  %583 = vst.msk [vmem:[#allocation2 + $0x88] sm:$0x3] %vm566_vm8, %v2262_v58 }
  0xa4   : > { %584 = vst.msk [vmem:[#allocation2 + $0x90] sm:$0xff] %vm564_vm7, %v2262_v58 }
  0xa5   : > { %v465_v37 = vsel %vm460_vm4, %v456_v34, %v1989_v31  ;;  %v466_v38 = vsel %vm460_vm4, %v457_v33, %v1990_v44  ;;  %v2008_v57 = vpop.permute.xlu2 %2007  ;;  %585 = vst.msk [vmem:[#allocation2 + $0x98] sm:$0x3] %vm566_vm8, %v2262_v58 }
  0xa6   : > { %v474_v39 = vsel %vm469_vm5, %v465_v37, %v1994_v36  ;;  %v475_v40 = vsel %vm469_vm5, %v466_v38, %v1995_v35  ;;  %v1998_v42 = vpop.permute.xlu0 %1997  ;;  %v2010_v50 = vunpack.i.h.bf16 %v2008_v57  ;;  %v2009_v51 = vunpack.i.l.bf16 %v2008_v57 }
  0xa7   : > { %v480_v41 = vpack.c.bf16 %v475_v40, %v474_v39  ;;  %v2000_v43 = vunpack.i.h.bf16 %v1998_v42  ;;  %v1999_v45 = vunpack.i.l.bf16 %v1998_v42 }
  0xa9   : > { %v459_v48 = vsel %vm451_vm0, %v2372_v32, %v2000_v43  ;;  %v458_v49 = vsel %vm451_vm0, %v2368_v24, %v1999_v45 }
  0xaa   : > { %v2003_v46 = vpop.permute.xlu1 %2002 }
  0xab   : > { %v2005_v9 = vunpack.i.h.bf16 %v2003_v46  ;;  %v2004_v47 = vunpack.i.l.bf16 %v2003_v46 }
  0xad   : > { %1843 = vmatmul.msk.bf16.gmra.mxu0 %vm514_vm6, %v479_v26  ;;  %v467_v52 = vsel %vm460_vm4, %v458_v49, %v2004_v47  ;;  %v468_v53 = vsel %vm460_vm4, %v459_v48, %v2005_v9 }
  0xae   : > { %v476_v54 = vsel %vm469_vm5, %v467_v52, %v2009_v51  ;;  %v477_v55 = vsel %vm469_vm5, %v468_v53, %v2010_v50 }
  0xaf   : > { %v481_v56 = vpack.c.bf16 %v477_v55, %v476_v54 }
  0xbd   : > { %1844 = vmatmul.msk.bf16.gmra.mxu0 %vm514_vm6, %v480_v41 }
  0xcd   : > { %1845 = vmatmul.msk.bf16.gmra.mxu0 %vm514_vm6, %v481_v56 }
 0x11a   : > { %v536_v24 = vpop.f32.mrf.mxu0 }
 0x11b   : > { %v556_v32 = vmax.f32 %v536_v24, 0.0 }
 0x11d   : > { %587 = vst.msk [vmem:[#allocation2 + $0x11] sm:$0xff] %vm564_vm7, %v556_v32 }
 0x122   : > { %v538_v59 = vpop.f32.mrf.mxu0 }
 0x123   : > { %v557_v62 = vmax.f32 %v538_v59, 0.0 }
 0x124   : > { %v863_v63 = vld [vmem:[#allocation2 + $0x12] sm:$0xff] }
 0x125   : > { %v2456_v0 = vld [vmem:[#allocation2 + $0x11] sm:$0xff]  ;;  %588 = vst.msk [vmem:[#allocation2 + $0x21] sm:$0xff] %vm564_vm7, %v557_v62  ;;  %v2016_v1 = vpack.i.bf16 %v863_v63, %v862_v60 }
 0x126   : > { %v2011_v2 = vpack.i.bf16 %v2456_v0, %v2454_v61  ;;  %v2465_v6 = vld [vmem:[#allocation2 + $0x10] sm:$0xff] }
 0x127   : > { %2017 = vrot.lane.b32.xlu2 %v2016_v1, %s2263_s10 }
 0x128   : > { %2012 = vrot.lane.b32.xlu0 %v2011_v2, %s2263_s10  ;;  %v1184_v2 = vld [vmem:[#allocation2 + $0x91] sm:$0xff] }
 0x12a   : > { %v541_v3 = vpop.f32.mrf.mxu0 }
 0x12b   : > { %v558_v4 = vmax.f32 %v541_v3, 0.0 }
 0x12c   : > { %v2463_v5 = vld [vmem:[#allocation2 + $0x21] sm:$0xff] }
 0x12d   : > { %v2467_v7 = vld [vmem:[#allocation2 + $0x20] sm:$0xff]  ;;  %589 = vst.msk [vmem:[#allocation2 + $0x31] sm:$0xff] %vm564_vm7, %v558_v4  ;;  %v2026_v8 = vpack.i.bf16 %v2463_v5, %v2456_v0  ;;  %v1434_v4 = vld [vmem:[#allocation2 + $0x92] sm:$0xff] }
 0x12e   : > { %v2021_v10 = vpack.i.bf16 %v2467_v7, %v2465_v6  ;;  %v1420_v12 = vld [vmem:[#allocation2 + $0x22] sm:$0xff] }
 0x12f   : > { %v2036_v14 = vpack.i.bf16 %v1420_v12, %v863_v63 }
 0x130   : > { %2027 = vrot.lane.b32.xlu0 %v2026_v8, %s2259_s26  ;;  %2022 = vrot.lane.b32.xlu1 %v2021_v10, %s2259_s26 }
 0x132   : > { %v543_v11 = vpop.f32.mrf.mxu0 }
 0x133   : > { %v559_v13 = vmax.f32 %v543_v11, 0.0 }
 0x134   : > { %v1428_v22 = vld [vmem:[#allocation2 + $0x32] sm:$0xff] }
 0x135   : > { %590 = vst.msk [vmem:[#allocation2 + $0x41] sm:$0xff] %vm564_vm7, %v559_v13  ;;  %v2051_v18 = vpack.i.bf16 %v1428_v22, %v1420_v12  ;;  %v2480_v16 = vld [vmem:[#allocation2 + $0x31] sm:$0xff] }
 0x136   : > { %v2482_v19 = vld [vmem:[#allocation2 + $0x30] sm:$0xff]  ;;  %v2041_v21 = vpack.i.bf16 %v2480_v16, %v2463_v5 }
 0x137   : > { %2052 = vrot.lane.b32.xlu2 %v2051_v18, %s2264_s11  ;;  %v2106_v45 = vpack.i.bf16 %v2482_v19, %v2467_v7 }
 0x138   : > { %2037 = vrot.lane.b32.xlu0 %v2036_v14, %s2263_s10  ;;  %2032 = vrot.lane.b32.xlu1 %v2036_v14, %s2264_s11  ;;  %v1921_v14 = vld [vmem:[%s3133_s2] sm:$0xff] }
 0x13a   : > { %v546_v15 = vpop.f32.mrf.mxu0 }
 0x13b   : > { %v560_v17 = vmax.f32 %v546_v15, 0.0 }
 0x13c   : > { %v2484_v20 = vld [vmem:[#allocation2 + $0x40] sm:$0xff] }
 0x13d   : > { %591 = vst.msk [vmem:[#allocation2 + $0x51] sm:$0xff] %vm564_vm7, %v560_v17  ;;  %v2061_v23 = vpack.i.bf16 %v2484_v20, %v2482_v19  ;;  %v873_v27 = vld [vmem:[#allocation2 + $0x42] sm:$0xff] }
 0x13e   : > { %v2076_v29 = vpack.i.bf16 %v873_v27, %v1428_v22  ;;  %v2497_v44 = vld [vmem:[#allocation2 + $0x41] sm:$0xff]  ;;  %v1176_v22 = vld [vmem:[#allocation2 + $0x90] sm:$0xff] }
 0x13f   : > { %2062 = vrot.lane.b32.xlu2 %v2061_v23, %s2259_s26  ;;  %v2066_v35 = vpack.i.bf16 %v2463_v5, %v2497_v44  ;;  %v2071_v41 = vpack.i.bf16 %v2497_v44, %v2480_v16 }
 0x140   : > { %2057 = vrot.lane.b32.xlu0 %v2051_v18, %s2263_s10  ;;  %2042 = vrot.lane.b32.xlu1 %v2041_v21, %s2263_s10 }
 0x142   : > { %v548_v25 = vpop.f32.mrf.mxu0 }
 0x143   : > { %v561_v26 = vmax.f32 %v548_v25, 0.0  ;;  %v1924_v25 = vld [vmem:[%s3133_s2 + $0x18] sm:$0xff] }
 0x144   : > { %v2499_v28 = vld [vmem:[#allocation2 + $0x51] sm:$0xff] }
 0x145   : > { %592 = vst.msk [vmem:[#allocation2 + $0x61] sm:$0xff] %vm564_vm7, %v561_v26  ;;  %v2501_v33 = vld [vmem:[#allocation2 + $0x50] sm:$0xff]  ;;  %v2081_v37 = vpack.i.bf16 %v2499_v28, %v2497_v44  ;;  %v2086_v43 = vpack.i.bf16 %v2499_v28, %v2456_v0 }
 0x146   : > { %v1430_v51 = vld [vmem:[#allocation2 + $0x52] sm:$0xff]  ;;  %v2166_v56 = vpack.i.bf16 %v2501_v33, %v2484_v20 }
 0x147   : > { %2077 = vrot.lane.b32.xlu2 %v2076_v29, %s2264_s11  ;;  %v2141_v52 = vpack.i.bf16 %v1430_v51, %v873_v27 }
 0x148   : > { %2047 = vrot.lane.b32.xlu1 %v2041_v21, %s2259_s26 }
 0x14a   : > { %v551_v30 = vpop.f32.mrf.mxu0 }
 0x14b   : > { %v562_v31 = vmax.f32 %v551_v30, 0.0  ;;  %v1928_v30 = vld [vmem:[%s3133_s2 + $0x38] sm:$0xff] }
 0x14c   : > { %v2503_v34 = vld [vmem:[#allocation2 + $0x60] sm:$0xff] }
 0x14d   : > { %593 = vst.msk [vmem:[#allocation2 + $0x71] sm:$0xff] %vm564_vm7, %v562_v31  ;;  %v2091_v36 = vpack.i.bf16 %v2503_v34, %v2501_v33  ;;  %v2515_v39 = vld [vmem:[#allocation2 + $0x61] sm:$0xff] }
 0x14e   : > { %v2096_v42 = vpack.i.bf16 %v2480_v16, %v2515_v39  ;;  %v875_v53 = vld [vmem:[#allocation2 + $0x62] sm:$0xff]  ;;  %v2151_v54 = vpack.i.bf16 %v2515_v39, %v2499_v28 }
 0x14f   : > { %2092 = vrot.lane.b32.xlu0 %v2091_v36, %s2259_s26  ;;  %2082 = vrot.lane.b32.xlu2 %v2081_v37, %s2263_s10  ;;  %v2156_v55 = vpack.i.bf16 %v875_v53, %v1430_v51  ;;  %v1927_v36 = vld [vmem:[%s3133_s2 + $0x30] sm:$0xff] }
 0x150   : > { %2067 = vrot.lane.b32.xlu1 %v2066_v35, %s2264_s11 }
 0x152   : > { %v553_v38 = vpop.f32.mrf.mxu0 }
 0x153   : > { %v563_v40 = vmax.f32 %v553_v38, 0.0 }
 0x154   : > { %v2532_v46 = vld [vmem:[#allocation2 + $0x71] sm:$0xff] }
 0x155   : > { %594 = vst.msk [vmem:[#allocation2 + $0x81] sm:$0xff] %vm564_vm7, %v563_v40  ;;  %v2538_v57 = vld [vmem:[#allocation2 + $0x70] sm:$0xff]  ;;  %v2116_v48 = vpack.i.bf16 %v2532_v46, %v2515_v39 }
 0x156   : > { %v1432_v58 = vld [vmem:[#allocation2 + $0x72] sm:$0xff]  ;;  %v2201_v59 = vpack.i.bf16 %v2538_v57, %v2503_v34 }
 0x157   : > { %2097 = vrot.lane.b32.xlu0 %v2096_v42, %s2264_s11  ;;  %2087 = vrot.lane.b32.xlu2 %v2086_v43, %s2264_s11  ;;  %v2186_v24 = vpack.i.bf16 %v1432_v58, %v875_v53 }
 0x158   : > { %2072 = vrot.lane.b32.xlu1 %v2071_v41, %s2259_s26 }
 0x15c   : > { %v2534_v9 = vld [vmem:[#allocation2 + $0x80] sm:$0xff] }
 0x15d   : > { %v2536_v47 = vld [vmem:[#allocation2 + $0x81] sm:$0xff]  ;;  %v2126_v49 = vpack.i.bf16 %v2534_v9, %v2538_v57  ;;  %v2241_v15 = vpack.i.bf16 %v1176_v22, %v2534_v9 }
 0x15e   : > { %v2136_v50 = vpack.i.bf16 %v2536_v47, %v2532_v46  ;;  %v877_v62 = vld [vmem:[#allocation2 + $0x82] sm:$0xff]  ;;  %v2226_v10 = vpack.i.bf16 %v1184_v2, %v2536_v47 }
 0x15f   : > { %2102 = vrot.lane.b32.xlu0 %v2026_v8, %s2263_s10  ;;  %2112 = vrot.lane.b32.xlu2 %v2041_v21, %s2264_s11  ;;  %v2216_v63 = vpack.i.bf16 %v877_v62, %v1432_v58  ;;  %v1922_v8 = vld [vmem:[%s3133_s2 + $0x8] sm:$0xff]  ;;  %v2231_v11 = vpack.i.bf16 %v1434_v4, %v877_v62 }
 0x160   : > { %2107 = vrot.lane.b32.xlu1 %v2106_v45, %s2259_s26  ;;  %786 = vmatpush.bf16.msrb.mxu0 %v1922_v8 }
 0x161   : > { %1929 = vmatpush.bf16.msra.mxu1 %v1922_v8  ;;  %1930 = vmatpush.bf16.msra.mxu2 %v1922_v8 }
 0x162   : > { %1931 = vmatpush.bf16.msra.mxu3 %v1922_v8 }
 0x164   : > { %787 = vmatpush.bf16.msrb.mxu0 %v1921_v14 }
 0x165   : > { %1932 = vmatpush.bf16.msra.mxu1 %v1921_v14  ;;  %1933 = vmatpush.bf16.msra.mxu2 %v1921_v14 }
 0x166   : > { %1934 = vmatpush.bf16.msra.mxu3 %v1921_v14 }
 0x167   : > { %2117 = vrot.lane.b32.xlu0 %v2116_v48, %s2263_s10  ;;  %2137 = vrot.lane.b32.xlu2 %v2136_v50, %s2264_s11 }
 0x168   : > { %2127 = vrot.lane.b32.xlu1 %v2126_v49, %s2259_s26 }
 0x169   : > { %1029 = vmatpush.bf16.msrb.mxu2 %v1924_v25  ;;  %1586 = vmatpush.bf16.msrb.mxu1 %v1928_v30 }
 0x16d   : > { %1587 = vmatpush.bf16.msrb.mxu1 %v1927_v36 }
 0x16f   : > { %2122 = vrot.lane.b32.xlu0 %v2076_v29, %s2263_s10  ;;  %2142 = vrot.lane.b32.xlu2 %v2141_v52, %s2264_s11  ;;  %v1923_v29 = vld [vmem:[%s3133_s2 + $0x10] sm:$0xff] }
 0x170   : > { %2132 = vrot.lane.b32.xlu1 %v2081_v37, %s2259_s26  ;;  %1030 = vmatpush.bf16.msrb.mxu2 %v1923_v29 }
 0x177   : > { %2147 = vrot.lane.b32.xlu0 %v2141_v52, %s2263_s10  ;;  %2157 = vrot.lane.b32.xlu2 %v2156_v55, %s2264_s11 }
 0x178   : > { %2152 = vrot.lane.b32.xlu1 %v2151_v54, %s2259_s26 }
 0x17f   : > { %2162 = vrot.lane.b32.xlu0 %v2071_v41, %s2263_s10  ;;  %2172 = vrot.lane.b32.xlu2 %v2081_v37, %s2264_s11  ;;  %v595_v41 = vld [vmem:[#allocation2] sm:$0xff] }
 0x180   : > { %2167 = vrot.lane.b32.xlu1 %v2166_v56, %s2259_s26 }
 0x181   : > { %v2565_v32 = vpop.permute.xlu2 %2017 }
 0x187   : > { %2177 = vrot.lane.b32.xlu0 %v2156_v55, %s2263_s10  ;;  %2187 = vrot.lane.b32.xlu2 %v2186_v24, %s2264_s11 }
 0x188   : > { %2182 = vrot.lane.b32.xlu1 %v2116_v48, %s2259_s26 }
 0x18f   : > { %2192 = vrot.lane.b32.xlu0 %v2186_v24, %s2263_s10  ;;  %2207 = vrot.lane.b32.xlu2 %v2116_v48, %s2264_s11 }
 0x190   : > { %2202 = vrot.lane.b32.xlu1 %v2201_v59, %s2259_s26 }
 0x191   : > { %v2572_v60 = vpop.permute.xlu2 %2052 }
 0x197   : > { %2197 = vrot.lane.b32.xlu0 %v2151_v54, %s2263_s10  ;;  %2217 = vrot.lane.b32.xlu2 %v2216_v63, %s2264_s11 }
 0x198   : > { %2212 = vrot.lane.b32.xlu1 %v2136_v50, %s2259_s26 }
 0x199   : > { %v2577_v1 = vpop.permute.xlu2 %2062 }
 0x19a   : > { %v2013_v3 = vpop.permute.xlu0 %2012  ;;  %v2065_v22 = vunpack.i.h.bf16 %v2577_v1  ;;  %v2064_v14 = vunpack.i.l.bf16 %v2577_v1 }
 0x19b   : > { %v2015_v37 = vunpack.i.h.bf16 %v2013_v3  ;;  %v2014_v38 = vunpack.i.l.bf16 %v2013_v3 }
 0x19d   : > { %v724_v51 = vsel %vm564_vm7, %v2465_v6, %v2015_v37 }
 0x19f   : > { %2222 = vrot.lane.b32.xlu0 %v2216_v63, %s2263_s10  ;;  %2232 = vrot.lane.b32.xlu2 %v2231_v11, %s2264_s11 }
 0x1a0   : > { %2227 = vrot.lane.b32.xlu1 %v2226_v10, %s2259_s26 }
 0x1a1   : > { %v2586_v13 = vpop.permute.xlu2 %2077 }
 0x1a2   : > { %v2023_v12 = vpop.permute.xlu1 %2022  ;;  %v2591_v18 = vpop.permute.xlu0 %2027 }
 0x1a3   : > { %v2025_v42 = vunpack.i.h.bf16 %v2023_v12  ;;  %v2024_v43 = vunpack.i.l.bf16 %v2023_v12 }
 0x1a5   : > { %v732_v53 = vsel %vm451_vm0, %v724_v51, %v2025_v42 }
 0x1a7   : > { %2237 = vrot.lane.b32.xlu0 %v2136_v50, %s2263_s10  ;;  %2247 = vrot.lane.b32.xlu2 %v2226_v10, %s2264_s11  ;;  %v723_v50 = vsel %vm564_vm7, %v595_v41, %v2014_v38 }
 0x1a8   : > { %2242 = vrot.lane.b32.xlu1 %v2241_v15, %s2259_s26  ;;  %v731_v54 = vsel %vm451_vm0, %v723_v50, %v2024_v43 }
 0x1a9   : > { %v2083_v21 = vpop.permute.xlu2 %2082 }
 0x1aa   : > { %v2597_v17 = vpop.permute.xlu1 %2032  ;;  %v2599_v23 = vpop.permute.xlu0 %2037  ;;  %v2084_v55 = vunpack.i.l.bf16 %v2083_v21  ;;  %v2085_v2 = vunpack.i.h.bf16 %v2083_v21 }
 0x1ab   : > { %v2040_v51 = vunpack.i.h.bf16 %v2599_v23 }
 0x1ac   : > { %v727_v4 = vsel %vm564_vm7, %v2484_v20, %v2084_v55  ;;  %v728_v29 = vsel %vm564_vm7, %v2501_v33, %v2085_v2 }
 0x1b1   : > { %v2088_v27 = vpop.permute.xlu2 %2087 }
 0x1b2   : > { %v2043_v26 = vpop.permute.xlu1 %2042  ;;  %v2610_v31 = vpop.permute.xlu0 %2057  ;;  %v2089_v45 = vunpack.i.l.bf16 %v2088_v27  ;;  %v2090_v30 = vunpack.i.h.bf16 %v2088_v27  ;;  %v1925_v27 = vld [vmem:[%s3133_s2 + $0x20] sm:$0xff] }
 0x1b3   : > { %v2045_v56 = vunpack.i.h.bf16 %v2043_v26  ;;  %v2044_v58 = vunpack.i.l.bf16 %v2043_v26  ;;  %v1926_v26 = vld [vmem:[%s3133_s2 + $0x28] sm:$0xff] }
 0x1b4   : > { %v740_v24 = vsel %vm739_vm9, %v731_v54, %v2089_v45  ;;  %1344 = vmatpush.bf16.msrb.mxu3 %v1926_v26 }
 0x1b5   : > { %v725_v8 = vsel %vm564_vm7, %v2467_v7, %v2044_v58  ;;  %v726_v10 = vsel %vm564_vm7, %v2482_v19, %v2045_v56 }
 0x1b6   : > { %v733_v41 = vsel %vm451_vm0, %v725_v8, %v2064_v14  ;;  %v734_v1 = vsel %vm451_vm0, %v726_v10, %v2065_v22  ;;  %v2055_v10 = vunpack.i.h.bf16 %v2572_v60 }
 0x1b8   : > { %1345 = vmatpush.bf16.msrb.mxu3 %v1925_v27 }
 0x1b9   : > { %v2617_v40 = vpop.permute.xlu2 %2112 }
 0x1ba   : > { %v2612_v35 = vpop.permute.xlu1 %2047 }
 0x1bb   : > { %v2050_v55 = vunpack.i.h.bf16 %v2612_v35  ;;  %v2049_v56 = vunpack.i.l.bf16 %v2612_v35  ;;  %v2034_v35 = vunpack.i.l.bf16 %v2597_v17 }
 0x1c1   : > { %v2093_v49 = vpop.permute.xlu0 %2092  ;;  %v2633_v12 = vpop.permute.xlu2 %2137 }
 0x1c2   : > { %v2068_v48 = vpop.permute.xlu1 %2067  ;;  %v2094_v63 = vunpack.i.l.bf16 %v2093_v49  ;;  %v2095_v3 = vunpack.i.h.bf16 %v2093_v49 }
 0x1c3   : > { %v2070_v52 = vunpack.i.h.bf16 %v2068_v48  ;;  %v2069_v11 = vunpack.i.l.bf16 %v2068_v48 }
 0x1c4   : > { %v735_v15 = vsel %vm451_vm0, %v727_v4, %v2094_v63  ;;  %v736_v38 = vsel %vm451_vm0, %v728_v29, %v2095_v3  ;;  %v2029_v63 = vunpack.i.l.bf16 %v2591_v18  ;;  %v2035_v3 = vunpack.i.h.bf16 %v2597_v17 }
 0x1c5   : > { %v741_v59 = vsel %vm739_vm9, %v732_v53, %v2070_v52  ;;  %v743_v43 = vsel %vm739_vm9, %v734_v1, %v2069_v11  ;;  %v744_v45 = vsel %vm739_vm9, %v735_v15, %v2090_v30  ;;  %v2039_v52 = vunpack.i.l.bf16 %v2599_v23 }
 0x1c6   : > { %v748_v62 = vpack.c.bf16 %v741_v59, %v740_v24  ;;  %v2020_v24 = vunpack.i.h.bf16 %v2565_v32  ;;  %v2019_v59 = vunpack.i.l.bf16 %v2565_v32  ;;  %v1524_v23 = vsel %vm564_vm7, %v2463_v5, %v2040_v51 }
 0x1c7   : > { %v1523_v2 = vsel %vm564_vm7, %v2456_v0, %v2039_v52  ;;  %v1532_v4 = vsel %vm451_vm0, %v1524_v23, %v2050_v55  ;;  %v2054_v11 = vunpack.i.l.bf16 %v2572_v60  ;;  %v2140_v60 = vunpack.i.h.bf16 %v2633_v12 }
 0x1c8   : > { %1854 = vmatmul.msk.bf16.vlgmr.msrb.gmra.mxu0 %vm460_vm4, %v748_v62  ;;  %v2030_v62 = vunpack.i.h.bf16 %v2591_v18  ;;  %v1531_v8 = vsel %vm451_vm0, %v1523_v2, %v2049_v56  ;;  %v966_v32 = vsel %vm564_vm7, %v2454_v61, %v2019_v59  ;;  %v967_v18 = vsel %vm564_vm7, %v2456_v0, %v2020_v24 }
 0x1c9   : > { %v2098_v25 = vpop.permute.xlu0 %2097  ;;  %v2665_v58 = vpop.permute.xlu2 %2142  ;;  %v974_v14 = vsel %vm451_vm0, %v966_v32, %v2029_v63  ;;  %v1539_v29 = vsel %vm739_vm9, %v1531_v8, %v2054_v11  ;;  %v1540_v61 = vsel %vm739_vm9, %v1532_v4, %v2055_v10  ;;  %v2060_v51 = vunpack.i.h.bf16 %v2610_v31 }
 0x1ca   : > { %v2638_v21 = vpop.permute.xlu1 %2072  ;;  %v2100_v36 = vunpack.i.h.bf16 %v2098_v25  ;;  %v2099_v37 = vunpack.i.l.bf16 %v2098_v25  ;;  %v975_v22 = vsel %vm451_vm0, %v967_v18, %v2030_v62  ;;  %v982_v15 = vsel %vm739_vm9, %v974_v14, %v2034_v35 }
 0x1cb   : > { %v983_v17 = vsel %vm739_vm9, %v975_v22, %v2035_v3  ;;  %v2059_v52 = vunpack.i.l.bf16 %v2610_v31  ;;  %v2075_v23 = vunpack.i.h.bf16 %v2638_v21  ;;  %v2074_v2 = vunpack.i.l.bf16 %v2638_v21 }
 0x1cc   : > { %v742_v42 = vsel %vm739_vm9, %v733_v41, %v2100_v36  ;;  %v745_v48 = vsel %vm739_vm9, %v736_v38, %v2099_v37  ;;  %v2139_v38 = vunpack.i.l.bf16 %v2633_v12  ;;  %v969_v18 = vsel %vm564_vm7, %v2480_v16, %v2060_v51 }
 0x1cd   : > { %v749_v49 = vpack.c.bf16 %v743_v43, %v742_v42  ;;  %v750_v50 = vpack.c.bf16 %v745_v48, %v744_v45  ;;  %v990_v43 = vpack.c.bf16 %v983_v17, %v982_v15  ;;  %v977_v22 = vsel %vm451_vm0, %v969_v18, %v2075_v23 }
 0x1ce   : > { %v2145_v15 = vunpack.i.h.bf16 %v2665_v58 }
 0x1cf   : > { %1855 = vmatmul.msk.bf16.vlgmr.msra.gmra.mxu1 %vm460_vm4, %v749_v49  ;;  %1856 = vmatmul.msk.bf16.vlgmr.msra.gmra.mxu2 %vm460_vm4, %v750_v50  ;;  %v1547_v49 = vpack.c.bf16 %v1540_v61, %v1539_v29 }
 0x1d1   : > { %v2661_v54 = vpop.permute.xlu0 %2102  ;;  %v2693_v41 = vpop.permute.xlu2 %2157 }
 0x1d2   : > { %v2659_v53 = vpop.permute.xlu1 %2107  ;;  %v2105_v24 = vunpack.i.h.bf16 %v2661_v54  ;;  %v2104_v59 = vunpack.i.l.bf16 %v2661_v54  ;;  %v968_v54 = vsel %vm564_vm7, %v2463_v5, %v2059_v52  ;;  %v2080_v5 = vunpack.i.h.bf16 %v2586_v13 }
 0x1d3   : > { %v2110_v8 = vunpack.i.h.bf16 %v2659_v53  ;;  %v2109_v32 = vunpack.i.l.bf16 %v2659_v53  ;;  %v976_v14 = vsel %vm451_vm0, %v968_v54, %v2074_v2  ;;  %v2160_v2 = vunpack.i.h.bf16 %v2693_v41 }
 0x1d4   : > { %v1282_v21 = vsel %vm564_vm7, %v2467_v7, %v2105_v24  ;;  %v1281_v10 = vsel %vm564_vm7, %v2465_v6, %v2104_v59  ;;  %v2144_v7 = vunpack.i.l.bf16 %v2665_v58  ;;  %v2115_v6 = vunpack.i.h.bf16 %v2617_v40 }
 0x1d5   : > { %v1289_v29 = vsel %vm451_vm0, %v1281_v10, %v2109_v32 }
 0x1d9   : > { %v2118_v25 = vpop.permute.xlu0 %2117  ;;  %v2726_v11 = vpop.permute.xlu2 %2172 }
 0x1da   : > { %v2128_v26 = vpop.permute.xlu1 %2127  ;;  %v2120_v30 = vunpack.i.h.bf16 %v2118_v25  ;;  %v2119_v0 = vunpack.i.l.bf16 %v2118_v25  ;;  %v2114_v25 = vunpack.i.l.bf16 %v2617_v40 }
 0x1db   : > { %v2130_v36 = vunpack.i.h.bf16 %v2128_v26  ;;  %v2129_v37 = vunpack.i.l.bf16 %v2128_v26  ;;  %v1290_v26 = vsel %vm451_vm0, %v1282_v21, %v2110_v8 }
 0x1dc   : > { %v729_v1 = vsel %vm564_vm7, %v2503_v34, %v2119_v0  ;;  %v730_v42 = vsel %vm564_vm7, %v2538_v57, %v2120_v30  ;;  %v1297_v58 = vsel %vm739_vm9, %v1289_v29, %v2114_v25 }
 0x1dd   : > { %v738_v45 = vsel %vm451_vm0, %v730_v42, %v2130_v36  ;;  %v737_v48 = vsel %vm451_vm0, %v729_v1, %v2129_v37  ;;  %v985_v36 = vsel %vm739_vm9, %v977_v22, %v2080_v5 }
 0x1de   : > { %v746_v50 = vsel %vm739_vm9, %v737_v48, %v2139_v38  ;;  %v747_v27 = vsel %vm739_vm9, %v738_v45, %v2140_v60  ;;  %v1298_v60 = vsel %vm739_vm9, %v1290_v26, %v2115_v6 }
 0x1df   : > { %1870 = vmatmul.msk.bf16.vlgmr.msrb.gmra.mxu2 %vm460_vm4, %v990_v43  ;;  %1902 = vmatmul.msk.bf16.vlgmr.msrb.gmra.mxu1 %vm460_vm4, %v1547_v49  ;;  %v751_v12 = vpack.c.bf16 %v747_v27, %v746_v50  ;;  %v1305_v43 = vpack.c.bf16 %v1298_v60, %v1297_v58 }
 0x1e1   : > { %v2123_v55 = vpop.permute.xlu0 %2122  ;;  %1857 = vmatmul.msk.bf16.vlgmr.msra.gmra.mxu3 %vm460_vm4, %v751_v12  ;;  %v2188_v45 = vpop.permute.xlu2 %2187 }
 0x1e2   : > { %v2133_v56 = vpop.permute.xlu1 %2132  ;;  %v2125_v62 = vunpack.i.h.bf16 %v2123_v55  ;;  %v2124_v63 = vunpack.i.l.bf16 %v2123_v55 }
 0x1e3   : > { %v2135_v3 = vunpack.i.h.bf16 %v2133_v56  ;;  %v2134_v35 = vunpack.i.l.bf16 %v2133_v56 }
 0x1e4   : > { %v1526_v4 = vsel %vm564_vm7, %v2497_v44, %v2125_v62  ;;  %v1525_v31 = vsel %vm564_vm7, %v2480_v16, %v2124_v63  ;;  %v2079_v16 = vunpack.i.l.bf16 %v2586_v13 }
 0x1e5   : > { %v1534_v53 = vsel %vm451_vm0, %v1526_v4, %v2135_v3  ;;  %v1533_v17 = vsel %vm451_vm0, %v1525_v31, %v2134_v35  ;;  %v2159_v3 = vunpack.i.l.bf16 %v2693_v41  ;;  %v2175_v35 = vunpack.i.h.bf16 %v2726_v11 }
 0x1e6   : > { %v984_v0 = vsel %vm739_vm9, %v976_v14, %v2079_v16  ;;  %v1541_v13 = vsel %vm739_vm9, %v1533_v17, %v2144_v7  ;;  %v1542_v37 = vsel %vm739_vm9, %v1534_v53, %v2145_v15  ;;  %v2190_v41 = vunpack.i.h.bf16 %v2188_v45 }
 0x1e7   : > { %v991_v38 = vpack.c.bf16 %v985_v36, %v984_v0  ;;  %v1548_v40 = vpack.c.bf16 %v1542_v37, %v1541_v13  ;;  %v2189_v14 = vunpack.i.l.bf16 %v2188_v45 }
 0x1e9   : > { %v2148_v61 = vpop.permute.xlu0 %2147  ;;  %v2208_v18 = vpop.permute.xlu2 %2207 }
 0x1ea   : > { %v2153_v30 = vpop.permute.xlu1 %2152  ;;  %v2150_v1 = vunpack.i.h.bf16 %v2148_v61  ;;  %v2149_v42 = vunpack.i.l.bf16 %v2148_v61  ;;  %v2210_v13 = vunpack.i.h.bf16 %v2208_v18  ;;  %v2209_v37 = vunpack.i.l.bf16 %v2208_v18 }
 0x1eb   : > { %v2155_v50 = vunpack.i.h.bf16 %v2153_v30  ;;  %v2154_v27 = vunpack.i.l.bf16 %v2153_v30 }
 0x1ec   : > { %v971_v52 = vsel %vm564_vm7, %v2499_v28, %v2150_v1  ;;  %v970_v55 = vsel %vm564_vm7, %v2497_v44, %v2149_v42  ;;  %v2174_v44 = vunpack.i.l.bf16 %v2726_v11 }
 0x1ed   : > { %v979_v59 = vsel %vm451_vm0, %v971_v52, %v2155_v50  ;;  %v978_v62 = vsel %vm451_vm0, %v970_v55, %v2154_v27 }
 0x1ee   : > { %v986_v54 = vsel %vm739_vm9, %v978_v62, %v2159_v3 }
 0x1ef   : > { %1871 = vmatmul.msk.bf16.gmra.mxu2 %vm460_vm4, %v991_v38  ;;  %1903 = vmatmul.msk.bf16.gmra.mxu1 %vm460_vm4, %v1548_v40 }
 0x1f1   : > { %v2163_v48 = vpop.permute.xlu0 %2162  ;;  %1886 = vmatmul.msk.bf16.vlgmr.msrb.gmra.mxu3 %vm460_vm4, %v1305_v43 }
 0x1f2   : > { %v2168_v49 = vpop.permute.xlu1 %2167  ;;  %v2165_v12 = vunpack.i.h.bf16 %v2163_v48  ;;  %v2164_v51 = vunpack.i.l.bf16 %v2163_v48 }
 0x1f3   : > { %v2170_v56 = vunpack.i.h.bf16 %v2168_v49  ;;  %v2169_v24 = vunpack.i.l.bf16 %v2168_v49 }
 0x1f4   : > { %v1284_v63 = vsel %vm564_vm7, %v2484_v20, %v2165_v12  ;;  %v1283_v23 = vsel %vm564_vm7, %v2482_v19, %v2164_v51  ;;  %v987_v20 = vsel %vm739_vm9, %v979_v59, %v2160_v2 }
 0x1f5   : > { %v1292_v4 = vsel %vm451_vm0, %v1284_v63, %v2170_v56  ;;  %v1291_v31 = vsel %vm451_vm0, %v1283_v23, %v2169_v24  ;;  %v992_v7 = vpack.c.bf16 %v987_v20, %v986_v54 }
 0x1f6   : > { %v1299_v17 = vsel %vm739_vm9, %v1291_v31, %v2174_v44  ;;  %v1300_v5 = vsel %vm739_vm9, %v1292_v4, %v2175_v35 }
 0x1f7   : > { %v1306_v26 = vpack.c.bf16 %v1300_v5, %v1299_v17 }
 0x1f9   : > { %v2178_v8 = vpop.permute.xlu0 %2177 }
 0x1fa   : > { %v2183_v32 = vpop.permute.xlu1 %2182  ;;  %v2180_v19 = vunpack.i.h.bf16 %v2178_v8  ;;  %v2179_v21 = vunpack.i.l.bf16 %v2178_v8 }
 0x1fb   : > { %v2185_v10 = vunpack.i.h.bf16 %v2183_v32  ;;  %v2184_v22 = vunpack.i.l.bf16 %v2183_v32 }
 0x1fc   : > { %v1528_v11 = vsel %vm564_vm7, %v2515_v39, %v2180_v19  ;;  %v1527_v53 = vsel %vm564_vm7, %v2499_v28, %v2179_v21  ;;  %v2218_v28 = vpop.permute.xlu2 %2217 }
 0x1fd   : > { %v1536_v16 = vsel %vm451_vm0, %v1528_v11, %v2185_v10  ;;  %v1535_v15 = vsel %vm451_vm0, %v1527_v53, %v2184_v22  ;;  %v2220_v58 = vunpack.i.h.bf16 %v2218_v28  ;;  %v2219_v60 = vunpack.i.l.bf16 %v2218_v28 }
 0x1fe   : > { %v1543_v6 = vsel %vm739_vm9, %v1535_v15, %v2189_v14  ;;  %v1544_v25 = vsel %vm739_vm9, %v1536_v16, %v2190_v41 }
 0x1ff   : > { %1872 = vmatmul.msk.bf16.gmra.mxu2 %vm460_vm4, %v992_v7  ;;  %v1549_v29 = vpack.c.bf16 %v1544_v25, %v1543_v6 }
 0x201   : > { %v2193_v61 = vpop.permute.xlu0 %2192  ;;  %1887 = vmatmul.msk.bf16.gmra.mxu3 %vm460_vm4, %v1306_v26  ;;  %1904 = vmatmul.msk.bf16.gmra.mxu1 %vm460_vm4, %v1549_v29 }
 0x202   : > { %v2203_v30 = vpop.permute.xlu1 %2202  ;;  %v2195_v0 = vunpack.i.h.bf16 %v2193_v61  ;;  %v2194_v36 = vunpack.i.l.bf16 %v2193_v61 }
 0x203   : > { %v2205_v50 = vunpack.i.h.bf16 %v2203_v30  ;;  %v2204_v27 = vunpack.i.l.bf16 %v2203_v30 }
 0x204   : > { %v973_v48 = vsel %vm564_vm7, %v2532_v46, %v2195_v0  ;;  %v972_v49 = vsel %vm564_vm7, %v2515_v39, %v2194_v36  ;;  %v2233_v62 = vpop.permute.xlu2 %2232 }
 0x205   : > { %v2235_v8 = vunpack.i.h.bf16 %v2233_v62  ;;  %v2234_v32 = vunpack.i.l.bf16 %v2233_v62 }
 0x209   : > { %v2198_v38 = vpop.permute.xlu0 %2197 }
 0x20a   : > { %v2213_v40 = vpop.permute.xlu1 %2212  ;;  %v2200_v1 = vunpack.i.h.bf16 %v2198_v38  ;;  %v2199_v42 = vunpack.i.l.bf16 %v2198_v38 }
 0x20b   : > { %v2215_v43 = vunpack.i.h.bf16 %v2213_v40  ;;  %v2214_v45 = vunpack.i.l.bf16 %v2213_v40 }
 0x20c   : > { %v1286_v12 = vsel %vm564_vm7, %v2503_v34, %v2200_v1  ;;  %v1285_v51 = vsel %vm564_vm7, %v2501_v33, %v2199_v42  ;;  %v2248_v41 = vpop.permute.xlu2 %2247 }
 0x20d   : > { %v981_v52 = vsel %vm451_vm0, %v973_v48, %v2215_v43  ;;  %v980_v55 = vsel %vm451_vm0, %v972_v49, %v2214_v45  ;;  %v1293_v59 = vsel %vm451_vm0, %v1285_v51, %v2204_v27  ;;  %v1294_v39 = vsel %vm451_vm0, %v1286_v12, %v2205_v50 }
 0x20e   : > { %v988_v56 = vsel %vm739_vm9, %v980_v55, %v2219_v60  ;;  %v989_v24 = vsel %vm739_vm9, %v981_v52, %v2220_v58  ;;  %v1301_v23 = vsel %vm739_vm9, %v1293_v59, %v2209_v37  ;;  %v1302_v34 = vsel %vm739_vm9, %v1294_v39, %v2210_v13 }
 0x20f   : > { %v993_v63 = vpack.c.bf16 %v989_v24, %v988_v56  ;;  %v1307_v2 = vpack.c.bf16 %v1302_v34, %v1301_v23  ;;  %v2250_v16 = vunpack.i.h.bf16 %v2248_v41 }
 0x211   : > { %1873 = vmatmul.msk.bf16.gmra.mxu2 %vm460_vm4, %v993_v63  ;;  %v2223_v33 = vpop.permute.xlu0 %2222  ;;  %1888 = vmatmul.msk.bf16.gmra.mxu3 %vm460_vm4, %v1307_v2 }
 0x212   : > { %v2228_v3 = vpop.permute.xlu1 %2227  ;;  %v2225_v35 = vunpack.i.h.bf16 %v2223_v33  ;;  %v2224_v44 = vunpack.i.l.bf16 %v2223_v33 }
 0x213   : > { %v2230_v4 = vunpack.i.h.bf16 %v2228_v3  ;;  %v2229_v31 = vunpack.i.l.bf16 %v2228_v3 }
 0x214   : > { %v1529_v54 = vsel %vm564_vm7, %v2532_v46, %v2224_v44  ;;  %v1530_v20 = vsel %vm564_vm7, %v2536_v47, %v2225_v35  ;;  %v2249_v47 = vunpack.i.l.bf16 %v2248_v41 }
 0x215   : > { %v1538_v18 = vsel %vm451_vm0, %v1530_v20, %v2230_v4  ;;  %v1537_v19 = vsel %vm451_vm0, %v1529_v54, %v2229_v31 }
 0x216   : > { %v1545_v21 = vsel %vm739_vm9, %v1537_v19, %v2234_v32  ;;  %v1546_v10 = vsel %vm739_vm9, %v1538_v18, %v2235_v8 }
 0x217   : > { %v1550_v22 = vpack.c.bf16 %v1546_v10, %v1545_v21 }
 0x219   : > { %v2238_v14 = vpop.permute.xlu0 %2237  ;;  %1905 = vmatmul.msk.bf16.gmra.mxu1 %vm460_vm4, %v1550_v22 }
 0x21a   : > { %v2243_v11 = vpop.permute.xlu1 %2242  ;;  %v2240_v53 = vunpack.i.h.bf16 %v2238_v14  ;;  %v2239_v17 = vunpack.i.l.bf16 %v2238_v14 }
 0x21b   : > { %v2245_v46 = vunpack.i.h.bf16 %v2243_v11  ;;  %v2244_v5 = vunpack.i.l.bf16 %v2243_v11 }
 0x21c   : > { %v1287_v15 = vsel %vm564_vm7, %v2538_v57, %v2239_v17  ;;  %v1288_v7 = vsel %vm564_vm7, %v2534_v9, %v2240_v53 }
 0x21d   : > { %v1296_v6 = vsel %vm451_vm0, %v1288_v7, %v2245_v46  ;;  %v1295_v25 = vsel %vm451_vm0, %v1287_v15, %v2244_v5 }
 0x21e   : > { %v1303_v26 = vsel %vm739_vm9, %v1295_v25, %v2249_v47  ;;  %v1304_v29 = vsel %vm739_vm9, %v1296_v6, %v2250_v16 }
 0x21f   : > { %v1308_v61 = vpack.c.bf16 %v1304_v29, %v1303_v26 }
 0x221   : > { %1889 = vmatmul.msk.bf16.gmra.mxu3 %vm460_vm4, %v1308_v61 }
 0x245   : > { %v2846_v40 = vpop.f32.mrf.mxu0 }
 0x246   : > { %v832_v27 = vmul.f32 %v2846_v40, %v2846_v40  ;;  %v810_v51 = vsel %vm809_vm10, %v2846_v40, 0.0 }
 0x248   : > { %v840_v24 = vsel %vm809_vm10, %v832_v27, 0.0 }
 0x24c   : > { %v2816_v30 = vpop.f32.mrf.mxu1 }
 0x24d   : > { %v2858_v45 = vpop.f32.mrf.mxu0  ;;  %v813_v59 = vsel %vm809_vm10, %v2816_v30, 0.0  ;;  %v834_v39 = vmul.f32 %v2816_v30, %v2816_v30 }
 0x24e   : > { %v811_v49 = vsel %vm809_vm10, %v2858_v45, 0.0  ;;  %v833_v50 = vmul.f32 %v2858_v45, %v2858_v45 }
 0x24f   : > { %v812_v52 = vadd.f32 %v811_v49, %v810_v51  ;;  %v843_v35 = vsel %vm809_vm10, %v834_v39, 0.0 }
 0x250   : > { %v841_v56 = vsel %vm809_vm10, %v833_v50, 0.0 }
 0x251   : > { %v842_v23 = vadd.f32 %v841_v56, %v840_v24  ;;  %v814_v34 = vadd.f32 %v813_v59, %v812_v52 }
 0x252   : > { %v2818_v28 = vpop.f32.mrf.mxu2 }
 0x253   : > { %v844_v4 = vadd.f32 %v843_v35, %v842_v23  ;;  %v817_v31 = vsel %vm809_vm10, %v2818_v28, 0.0  ;;  %v836_v8 = vmul.f32 %v2818_v28, %v2818_v28 }
 0x254   : > { %v2820_v0 = vpop.f32.mrf.mxu1 }
 0x255   : > { %v815_v62 = vsel %vm809_vm10, %v2820_v0, 0.0  ;;  %v835_v63 = vmul.f32 %v2820_v0, %v2820_v0  ;;  %v847_v11 = vsel %vm809_vm10, %v836_v8, 0.0 }
 0x256   : > { %v816_v33 = vadd.f32 %v815_v62, %v814_v34 }
 0x257   : > { %v845_v44 = vsel %vm809_vm10, %v835_v63, 0.0 }
 0x258   : > { %v846_v20 = vadd.f32 %v845_v44, %v844_v4  ;;  %v818_v18 = vadd.f32 %v817_v31, %v816_v33 }
 0x25a   : > { %v2822_v57 = vpop.f32.mrf.mxu2  ;;  %v848_v5 = vadd.f32 %v847_v11, %v846_v20 }
 0x25b   : > { %v819_v32 = vsel %vm809_vm10, %v2822_v57, 0.0  ;;  %v837_v54 = vmul.f32 %v2822_v57, %v2822_v57 }
 0x25c   : > { %v2824_v9 = vpop.f32.mrf.mxu1  ;;  %v820_v22 = vadd.f32 %v819_v32, %v818_v18 }
 0x25d   : > { %1669 = vrot.lane.b32.xlu2 %v2824_v9, %s2265_s30  ;;  %v1631_v41 = vmul.f32 %v2824_v9, %v2824_v9  ;;  %v849_v53 = vsel %vm809_vm10, %v837_v54, 0.0  ;;  %v1609_v16 = vsel %vm809_vm10, %v2824_v9, 0.0 }
 0x25e   : > { %v850_v61 = vadd.f32 %v849_v53, %v848_v5 }
 0x25f   : > { %v1639_v49 = vsel %vm809_vm10, %v1631_v41, 0.0 }
 0x262   : > { %v2828_v36 = vpop.f32.mrf.mxu2 }
 0x263   : > { %v1074_v47 = vmul.f32 %v2828_v36, %v2828_v36  ;;  %v1052_v51 = vsel %vm809_vm10, %v2828_v36, 0.0 }
 0x264   : > { %v2830_v13 = vpop.f32.mrf.mxu3  ;;  %v2832_v37 = vpop.f32.mrf.mxu1 }
 0x265   : > { %1671 = vrot.lane.b32.xlu0 %v2832_v37, %s2265_s30  ;;  %v821_v19 = vsel %vm809_vm10, %v2830_v13, 0.0  ;;  %v838_v21 = vmul.f32 %v2830_v13, %v2830_v13  ;;  %v1632_v10 = vmul.f32 %v2832_v37, %v2832_v37  ;;  %v1610_v25 = vsel %vm809_vm10, %v2832_v37, 0.0 }
 0x266   : > { %v822_v15 = vadd.f32 %v821_v19, %v820_v22  ;;  %v1082_v24 = vsel %vm809_vm10, %v1074_v47, 0.0  ;;  %v1611_v39 = vadd.f32 %v1610_v25, %v1609_v16 }
 0x267   : > { %v851_v6 = vsel %vm809_vm10, %v838_v21, 0.0  ;;  %v1640_v26 = vsel %vm809_vm10, %v1632_v10, 0.0 }
 0x268   : > { %v852_v59 = vadd.f32 %v851_v6, %v850_v61  ;;  %v1641_v62 = vadd.f32 %v1640_v26, %v1639_v49 }
 0x26a   : > { %v2836_v58 = vpop.f32.mrf.mxu2 }
 0x26b   : > { %v1075_v17 = vmul.f32 %v2836_v58, %v2836_v58  ;;  %v1053_v37 = vsel %vm809_vm10, %v2836_v58, 0.0 }
 0x26c   : > { %v2838_v60 = vpop.f32.mrf.mxu3  ;;  %v2840_v38 = vpop.f32.mrf.mxu1  ;;  %v1054_v34 = vadd.f32 %v1053_v37, %v1052_v51 }
 0x26d   : > { %1112 = vrot.lane.b32.xlu0 %v2828_v36, %s2265_s30  ;;  %1673 = vrot.lane.b32.xlu1 %v2840_v38, %s2265_s30  ;;  %v823_v46 = vsel %vm809_vm10, %v2838_v60, 0.0  ;;  %v839_v29 = vmul.f32 %v2838_v60, %v2838_v60  ;;  %v1633_v50 = vmul.f32 %v2840_v38, %v2840_v38  ;;  %v1083_v52 = vsel %vm809_vm10, %v1075_v17, 0.0 }
 0x26e   : > { %v824_v9 = vadd.f32 %v823_v46, %v822_v15  ;;  %v1612_v23 = vsel %vm809_vm10, %v2840_v38, 0.0  ;;  %v1084_v33 = vadd.f32 %v1083_v52, %v1082_v24 }
 0x26f   : > { %v853_v63 = vsel %vm809_vm10, %v839_v29, 0.0  ;;  %v1642_v44 = vsel %vm809_vm10, %v1633_v50, 0.0  ;;  %v1613_v54 = vadd.f32 %v1612_v23, %v1611_v39 }
 0x270   : > { %v825_v35 = vrot.slane %v824_v9, 4  ;;  %v2961_v32 = vadd.f32 %v853_v63, %v852_v59  ;;  %v1643_v11 = vadd.f32 %v1642_v44, %v1641_v62 }
 0x272   : > { %v2848_v1 = vpop.f32.mrf.mxu2  ;;  %v2973_v41 = vadd.f32 %v825_v35, %v824_v9 }
 0x273   : > { %v1076_v56 = vmul.f32 %v2848_v1, %v2848_v1  ;;  %v1055_v36 = vsel %vm809_vm10, %v2848_v1, 0.0 }
 0x274   : > { %v2850_v42 = vpop.f32.mrf.mxu3  ;;  %v2852_v43 = vpop.f32.mrf.mxu1  ;;  %v1056_v20 = vadd.f32 %v1055_v36, %v1054_v34 }
 0x275   : > { %1114 = vrot.lane.b32.xlu1 %v2836_v58, %s2265_s30  ;;  %1675 = vrot.lane.b32.xlu2 %v2852_v43, %s2265_s30  ;;  %v1085_v4 = vsel %vm809_vm10, %v1076_v56, 0.0  ;;  %v1634_v31 = vmul.f32 %v2852_v43, %v2852_v43  ;;  %v1389_v18 = vmul.f32 %v2850_v42, %v2850_v42  ;;  %v1614_v21 = vsel %vm809_vm10, %v2852_v43, 0.0 }
 0x276   : > { %v1086_v53 = vadd.f32 %v1085_v4, %v1084_v33  ;;  %v1367_v43 = vsel %vm809_vm10, %v2850_v42, 0.0 }
 0x277   : > { %v1644_v5 = vsel %vm809_vm10, %v1634_v31, 0.0  ;;  %v1397_v26 = vsel %vm809_vm10, %v1389_v18, 0.0 }
 0x278   : > { %v1645_v9 = vadd.f32 %v1644_v5, %v1643_v11 }
 0x27a   : > { %v2860_v48 = vpop.f32.mrf.mxu2 }
 0x27b   : > { %v1077_v58 = vmul.f32 %v2860_v48, %v2860_v48  ;;  %v1057_v8 = vsel %vm809_vm10, %v2860_v48, 0.0 }
 0x27c   : > { %v2868_v12 = vpop.f32.mrf.mxu3  ;;  %v1058_v17 = vadd.f32 %v1057_v8, %v1056_v20 }
 0x27d   : > { %1116 = vrot.lane.b32.xlu2 %v2848_v1, %s2265_s30  ;;  %v1390_v37 = vmul.f32 %v2868_v12, %v2868_v12 }
 0x27e   : > { %v2874_v55 = vpop.f32.mrf.mxu1 }
 0x27f   : > { %1677 = vrot.lane.b32.xlu0 %v2874_v55, %s2265_s30  ;;  %v1635_v29 = vmul.f32 %v2874_v55, %v2874_v55 }
 0x282   : > { %v2888_v2 = vpop.f32.mrf.mxu2 }
 0x283   : > { %1120 = vrot.lane.b32.xlu1 %v2888_v2, %s2265_s30  ;;  %v1078_v38 = vmul.f32 %v2888_v2, %v2888_v2  ;;  %v1059_v10 = vsel %vm809_vm10, %v2888_v2, 0.0  ;;  %v1615_v2 = vadd.f32 %v1614_v21, %v1613_v54 }
 0x284   : > { %v2892_v3 = vpop.f32.mrf.mxu3  ;;  %v1060_v25 = vadd.f32 %v1059_v10, %v1058_v17 }
 0x285   : > { %v1089_v16 = vsel %vm809_vm10, %v1078_v38, 0.0  ;;  %v1391_v34 = vmul.f32 %v2892_v3, %v2892_v3  ;;  %v1368_v38 = vsel %vm809_vm10, %v2868_v12, 0.0 }
 0x286   : > { %v2936_v27 = vpop.f32.mrf.mxu1 }
 0x287   : > { %1118 = vrot.lane.b32.xlu0 %v2860_v48, %s2265_s30  ;;  %v1087_v48 = vsel %vm809_vm10, %v1077_v58, 0.0  ;;  %v1618_v52 = vsel %vm809_vm10, %v2936_v27, 0.0  ;;  %v1636_v56 = vmul.f32 %v2936_v27, %v2936_v27  ;;  %v1646_v58 = vsel %vm809_vm10, %v1635_v29, 0.0 }
 0x288   : > { %v1088_v6 = vadd.f32 %v1087_v48, %v1086_v53  ;;  %v1647_v18 = vadd.f32 %v1646_v58, %v1645_v9  ;;  %v1400_v5 = vsel %vm809_vm10, %v1391_v34, 0.0 }
 0x289   : > { %v1648_v20 = vsel %vm809_vm10, %v1636_v56, 0.0 }
 0x28a   : > { %v1044_v14 = vpop.f32.mrf.mxu2  ;;  %v1090_v50 = vadd.f32 %v1089_v16, %v1088_v6  ;;  %v1649_v16 = vadd.f32 %v1648_v20, %v1647_v18 }
 0x28b   : > { %1122 = vrot.lane.b32.xlu2 %v1044_v14, %s2265_s30  ;;  %v1079_v22 = vmul.f32 %v1044_v14, %v1044_v14  ;;  %v1061_v47 = vsel %vm809_vm10, %v1044_v14, 0.0  ;;  %v1616_v14 = vsel %vm809_vm10, %v2874_v55, 0.0 }
 0x28c   : > { %v2925_v7 = vpop.f32.mrf.mxu3  ;;  %v1062_v51 = vadd.f32 %v1061_v47, %v1060_v25  ;;  %v1617_v36 = vadd.f32 %v1616_v14, %v1615_v2  ;;  %v855_v14 = vrot.slane %v2961_v32, 4 }
 0x28d   : > { %v1091_v61 = vsel %vm809_vm10, %v1079_v22, 0.0  ;;  %v1370_v22 = vsel %vm809_vm10, %v2892_v3, 0.0  ;;  %v1392_v11 = vmul.f32 %v2925_v7, %v2925_v7 }
 0x28e   : > { %v1092_v39 = vadd.f32 %v1091_v61, %v1090_v50  ;;  %v1619_v54 = vadd.f32 %v1618_v52, %v1617_v36  ;;  %v856_v58 = vadd.f32 %v855_v14, %v2961_v32 }
 0x28f   : > { %v1402_v50 = vsel %vm809_vm10, %v1392_v11, 0.0 }
 0x290   : > { %v857_v32 = vrot.slane %v856_v58, 2 }
 0x294   : > { %v1047_v1 = vpop.f32.mrf.mxu2  ;;  %v2966_v19 = vpop.f32.mrf.mxu3 }
 0x295   : > { %1124 = vrot.lane.b32.xlu0 %v1047_v1, %s2265_s30  ;;  %v1080_v15 = vmul.f32 %v1047_v1, %v1047_v1  ;;  %v1063_v49 = vsel %vm809_vm10, %v1047_v1, 0.0  ;;  %v1398_v1 = vsel %vm809_vm10, %v1390_v37, 0.0  ;;  %v1393_v2 = vmul.f32 %v2966_v19, %v2966_v19 }
 0x296   : > { %v1604_v46 = vpop.f32.mrf.mxu1  ;;  %v1064_v62 = vadd.f32 %v1063_v49, %v1062_v51  ;;  %v1399_v29 = vadd.f32 %v1398_v1, %v1397_v26  ;;  %v1374_v51 = vsel %vm809_vm10, %v2966_v19, 0.0 }
 0x297   : > { %1681 = vrot.lane.b32.xlu2 %v1604_v46, %s2265_s30  ;;  %v1093_v24 = vsel %vm809_vm10, %v1080_v15, 0.0  ;;  %v1637_v33 = vmul.f32 %v1604_v46, %v1604_v46  ;;  %v1620_v44 = vsel %vm809_vm10, %v1604_v46, 0.0  ;;  %v1369_v46 = vadd.f32 %v1368_v38, %v1367_v43 }
 0x298   : > { %v1094_v35 = vadd.f32 %v1093_v24, %v1092_v39  ;;  %v1621_v53 = vadd.f32 %v1620_v44, %v1619_v54  ;;  %v1372_v15 = vsel %vm809_vm10, %v2925_v7, 0.0  ;;  %v1401_v52 = vadd.f32 %v1400_v5, %v1399_v29 }
 0x299   : > { %v1650_v17 = vsel %vm809_vm10, %v1637_v33, 0.0  ;;  %v1371_v61 = vadd.f32 %v1370_v22, %v1369_v46 }
 0x29a   : > { %v1651_v49 = vadd.f32 %v1650_v17, %v1649_v16 }
 0x29b   : > { %v1373_v26 = vadd.f32 %v1372_v15, %v1371_v61 }
 0x29c   : > { %v1049_v59 = vpop.f32.mrf.mxu2  ;;  %v2997_v55 = vpop.f32.mrf.mxu3 }
 0x29d   : > { %v1065_v63 = vsel %vm809_vm10, %v1049_v59, 0.0  ;;  %v1081_v23 = vmul.f32 %v1049_v59, %v1049_v59  ;;  %1126 = vrot.lane.b32.xlu1 %v1049_v59, %s2265_s30  ;;  %v1394_v37 = vmul.f32 %v2997_v55, %v2997_v55  ;;  %v1404_v59 = vsel %vm809_vm10, %v1393_v2, 0.0 }
 0x29e   : > { %v1066_v4 = vadd.f32 %v1065_v63, %v1064_v62  ;;  %v1606_v8 = vpop.f32.mrf.mxu1  ;;  %v1403_v63 = vadd.f32 %v1402_v50, %v1401_v52 }
 0x29f   : > { %v1095_v31 = vsel %vm809_vm10, %v1081_v23, 0.0  ;;  %1683 = vrot.lane.b32.xlu0 %v1606_v8, %s2265_s30  ;;  %v1622_v48 = vsel %vm809_vm10, %v1606_v8, 0.0  ;;  %v1638_v10 = vmul.f32 %v1606_v8, %v1606_v8  ;;  %v1375_v23 = vadd.f32 %v1374_v51, %v1373_v26 }
 0x2a0   : > { %v1096_v21 = vadd.f32 %v1095_v31, %v1094_v35  ;;  %v1067_v47 = vrot.slane %v1066_v4, 4  ;;  %v1623_v6 = vadd.f32 %v1622_v48, %v1621_v53  ;;  %v1406_v34 = vsel %vm809_vm10, %v1394_v37, 0.0 }
 0x2a1   : > { %v1652_v25 = vsel %vm809_vm10, %v1638_v10, 0.0  ;;  %v1405_v35 = vadd.f32 %v1404_v59, %v1403_v63  ;;  %v827_v8 = vrot.slane %v2973_v41, 2 }
 0x2a2   : > { %v1097_v9 = vrot.slane %v1096_v21, 4  ;;  %v1068_v56 = vadd.f32 %v1067_v47, %v1066_v4  ;;  %v1653_v24 = vadd.f32 %v1652_v25, %v1651_v49  ;;  %v1624_v39 = vrot.slane %v1623_v6, 4 }
 0x2a3   : > { %v1407_v20 = vadd.f32 %v1406_v34, %v1405_v35  ;;  %v828_v46 = vadd.f32 %v827_v8, %v2973_v41 }
 0x2a4   : > { %v3023_v43 = vpop.f32.mrf.mxu3  ;;  %v1098_v36 = vadd.f32 %v1097_v9, %v1096_v21  ;;  %v1069_v44 = vrot.slane %v1068_v56, 2  ;;  %v1654_v31 = vrot.slane %v1653_v24, 4  ;;  %v1625_v38 = vadd.f32 %v1624_v39, %v1623_v6 }
 0x2a5   : > { %1679 = vrot.lane.b32.xlu1 %v2936_v27, %s2265_s30  ;;  %v1376_v27 = vsel %vm809_vm10, %v2997_v55, 0.0  ;;  %v1395_v62 = vmul.f32 %v3023_v43, %v3023_v43  ;;  %v1378_v33 = vsel %vm809_vm10, %v3023_v43, 0.0  ;;  %v858_v6 = vadd.f32 %v857_v32, %v856_v58 }
 0x2a6   : > { %v1377_v4 = vadd.f32 %v1376_v27, %v1375_v23  ;;  %v1099_v54 = vrot.slane %v1098_v36, 2  ;;  %v1070_v22 = vadd.f32 %v1069_v44, %v1068_v56  ;;  %v1655_v11 = vadd.f32 %v1654_v31, %v1653_v24 }
 0x2a7   : > { %v1408_v1 = vsel %vm809_vm10, %v1395_v62, 0.0  ;;  %v1626_v5 = vrot.slane %v1625_v38, 2  ;;  %v829_v9 = vrot.slane %v828_v46, 1  ;;  %v859_v52 = vrot.slane %v858_v6, 1 }
 0x2a8   : > { %v1379_v18 = vadd.f32 %v1378_v33, %v1377_v4  ;;  %v1409_v53 = vadd.f32 %v1408_v1, %v1407_v20  ;;  %v1100_v47 = vadd.f32 %v1099_v54, %v1098_v36  ;;  %v1071_v25 = vrot.slane %v1070_v22, 1 }
 0x2a9   : > { %v1656_v29 = vrot.slane %v1655_v11, 2  ;;  %v1627_v14 = vadd.f32 %v1626_v5, %v1625_v38  ;;  %v830_v59 = vadd.f32 %v829_v9, %v828_v46  ;;  %v860_v58 = vadd.f32 %v859_v52, %v858_v6 }
 0x2aa   : > { %v1101_v50 = vrot.slane %v1100_v47, 1  ;;  %v1072_v26 = vadd.f32 %v1071_v25, %v1070_v22 }
 0x2ab   : > { %v1657_v41 = vadd.f32 %v1656_v29, %v1655_v11  ;;  %v1628_v27 = vrot.slane %v1627_v14, 1 }
 0x2ac   : > { %v3042_v21 = vpop.f32.mrf.mxu3  ;;  %v1102_v62 = vadd.f32 %v1101_v50, %v1100_v47  ;;  %v1073_v34 = vadd.f32 %v1072_v26, %v830_v59 }
 0x2ad   : > { %v1380_v48 = vsel %vm809_vm10, %v3042_v21, 0.0  ;;  %v1396_v10 = vmul.f32 %v3042_v21, %v3042_v21  ;;  %v1658_v33 = vrot.slane %v1657_v41, 1  ;;  %v1629_v31 = vadd.f32 %v1628_v27, %v1627_v14 }
 0x2ae   : > { %v1381_v17 = vadd.f32 %v1380_v48, %v1379_v18  ;;  %v1103_v4 = vadd.f32 %v1102_v62, %v860_v58 }
 0x2af   : > { %v1410_v16 = vsel %vm809_vm10, %v1396_v10, 0.0 }
 0x2b0   : > { %v1382_v15 = vrot.slane %v1381_v17, 4  ;;  %v1411_v2 = vadd.f32 %v1410_v16, %v1409_v53 }
 0x2b2   : > { %v1383_v61 = vadd.f32 %v1382_v15, %v1381_v17  ;;  %v1412_v49 = vrot.slane %v1411_v2, 4 }
 0x2b4   : > { %v1384_v51 = vrot.slane %v1383_v61, 2  ;;  %v1413_v37 = vadd.f32 %v1412_v49, %v1411_v2 }
 0x2b6   : > { %v1385_v56 = vadd.f32 %v1384_v51, %v1383_v61  ;;  %v1414_v24 = vrot.slane %v1413_v37, 2 }
 0x2b7   : > { %v1670_v39 = vpop.permute.xlu2 %1669 }
 0x2b8   : > { %v1386_v63 = vrot.slane %v1385_v56, 1  ;;  %v1415_v23 = vadd.f32 %v1414_v24, %v1413_v37  ;;  %v1693_v36 = vsel %vm809_vm10, %v2850_v42, %v1670_v39  ;;  %v1659_v42 = vadd.f32 %v1658_v33, %v1657_v41 }
 0x2b9   : > { %1906 = vst.msk [vmem:[%s3054_s9 + $0x40] sm:$0xff] %vm564_vm7, %v1693_v36 }
 0x2ba   : > { %v1387_v35 = vadd.f32 %v1386_v63, %v1385_v56  ;;  %v1416_v44 = vrot.slane %v1415_v23, 1 }
 0x2bc   : > { %v1388_v8 = vadd.f32 %v1387_v35, %v1073_v34  ;;  %v1417_v38 = vadd.f32 %v1416_v44, %v1415_v23 }
 0x2be   : > { %v1418_v1 = vadd.f32 %v1417_v38, %v1103_v4  ;;  %v1630_v54 = vadd.f32 %v1629_v31, %v1388_v8 }
 0x2c0   : > { %v1660_v20 = vadd.f32 %v1659_v42, %v1418_v1  ;;  %1711 = vst.msk [vmem:[%s238_s12] sm:$0x1] %vm1710_vm11, %v1630_v54 }
 0x2c2   : > { %1712 = vst.msk [vmem:[%s241_s15] sm:$0x1] %vm1710_vm11, %v1660_v20 }
 0x2cf   : > { %v1676_v18 = vpop.permute.xlu2 %1675 }
 0x2d0   : > { %v1696_v32 = vsel %vm809_vm10, %v2925_v7, %v1676_v18 }
 0x2d1   : > { %1909 = vst.msk [vmem:[%s3054_s9 + $0x58] sm:$0xff] %vm564_vm7, %v1696_v32 }
 0x2d7   : > { %v1672_v48 = vpop.permute.xlu0 %1671  ;;  %v1117_v10 = vpop.permute.xlu2 %1116 }
 0x2d8   : > { %v1694_v22 = vsel %vm809_vm10, %v2868_v12, %v1672_v48  ;;  %v1138_v11 = vsel %vm809_vm10, %v2816_v30, %v1117_v10 }
 0x2d9   : > { %1907 = vst.msk [vmem:[%s3054_s9 + $0x48] sm:$0xff] %vm564_vm7, %v1694_v22 }
 0x2da   : > { %1146 = vst.msk [vmem:[%s3054_s9 + $0x10] sm:$0xff] %vm564_vm7, %v1138_v11 }
 0x2df   : > { %v1113_v53 = vpop.permute.xlu0 %1112  ;;  %v1674_v17 = vpop.permute.xlu1 %1673 }
 0x2e0   : > { %v1136_v7 = vsel %vm809_vm10, %v2846_v40, %v1113_v53  ;;  %v1695_v46 = vsel %vm809_vm10, %v2892_v3, %v1674_v17 }
 0x2e1   : > { %1144 = vst.msk [vmem:[%s3054_s9] sm:$0xff] %vm564_vm7, %v1136_v7 }
 0x2e2   : > { %1908 = vst.msk [vmem:[%s3054_s9 + $0x50] sm:$0xff] %vm564_vm7, %v1695_v46 }
 0x2e5   : > { %v1123_v30 = vpop.permute.xlu2 %1122 }
 0x2e6   : > { %v1141_v12 = vsel %vm809_vm10, %v2822_v57, %v1123_v30 }
 0x2e7   : > { %1149 = vst.msk [vmem:[%s3054_s9 + $0x28] sm:$0xff] %vm564_vm7, %v1141_v12  ;;  %v1115_v5 = vpop.permute.xlu1 %1114 }
 0x2e8   : > { %v1137_v16 = vsel %vm809_vm10, %v2858_v45, %v1115_v5 }
 0x2e9   : > { %1145 = vst.msk [vmem:[%s3054_s9 + $0x8] sm:$0xff] %vm564_vm7, %v1137_v16 }
 0x2f1   : > { %v1678_v40 = vpop.permute.xlu0 %1677  ;;  %v1682_v3 = vpop.permute.xlu2 %1681 }
 0x2f2   : > { %v1697_v47 = vsel %vm809_vm10, %v2966_v19, %v1678_v40  ;;  %v1699_v15 = vsel %vm809_vm10, %v3023_v43, %v1682_v3 }
 0x2f3   : > { %1910 = vst.msk [vmem:[%s3054_s9 + $0x60] sm:$0xff] %vm564_vm7, %v1697_v47 }
 0x2f4   : > { %1912 = vst.msk [vmem:[%s3054_s9 + $0x70] sm:$0xff] %vm564_vm7, %v1699_v15 }
 0x2f5   : > { %v1121_v57 = vpop.permute.xlu1 %1120 }
 0x2f6   : > { %v1140_v45 = vsel %vm809_vm10, %v2818_v28, %v1121_v57 }
 0x2f7   : > { %1148 = vst.msk [vmem:[%s3054_s9 + $0x20] sm:$0xff] %vm564_vm7, %v1140_v45 }
 0x2f9   : > { %v1119_v2 = vpop.permute.xlu0 %1118 }
 0x2fa   : > { %v1139_v6 = vsel %vm809_vm10, %v2820_v0, %v1119_v2 }
 0x2fb   : > { %1147 = vst.msk [vmem:[%s3054_s9 + $0x18] sm:$0xff] %vm564_vm7, %v1139_v6 }
 0x307   : > { %v1125_v19 = vpop.permute.xlu0 %1124 }
 0x308   : > { %v1142_v43 = vsel %vm809_vm10, %v2830_v13, %v1125_v19 }
 0x309   : > { %1150 = vst.msk [vmem:[%s3054_s9 + $0x30] sm:$0xff] %vm564_vm7, %v1142_v43 }
 0x30f   : > { %v1127_v25 = vpop.permute.xlu1 %1126 }
 0x310   : > { %v1143_v29 = vsel %vm809_vm10, %v2838_v60, %v1127_v25 }
 0x311   : > { %1151 = vst.msk [vmem:[%s3054_s9 + $0x38] sm:$0xff] %vm564_vm7, %v1143_v29  ;;  %v1684_v28 = vpop.permute.xlu0 %1683 }
 0x312   : > { %v1700_v61 = vsel %vm809_vm10, %v3042_v21, %v1684_v28 }
 0x313   : > { %1913 = vst.msk [vmem:[%s3054_s9 + $0x78] sm:$0xff] %vm564_vm7, %v1700_v61 }
 0x317   : > { %v1680_v0 = vpop.permute.xlu1 %1679 }
 0x318   : > { %v1698_v49 = vsel %vm809_vm10, %v2997_v55, %v1680_v0 }
 0x319   : > { %1911 = vst.msk [vmem:[%s3054_s9 + $0x68] sm:$0xff] %vm564_vm7, %v1698_v49 }
 0x31a PF: > { %s16_s18 = sadd.s32 1, %s2257_s18  }
 0x31b   : > { %p13_p4 = scmp.ge.s32.totalorder %s16_s18, 4  }
 0x31d   :  { %15 = sbr.rel (!%p13_p4) target bundleno = 1 (0x1), region = 92 }

</bundles_post_ra>
